<compile_context>
chip_gen: v5e
topology: v5e:2x2
jax: 0.10.0
libtpu: 0.0.40
codegen_flags: <defaults>
</compile_context>

<pallas_src>
import jax
import jax.numpy as jnp
from jax.experimental import pallas as pl
from jax.experimental.pallas import tpu as pltpu


NUM_CLASSES = 10
D_IN = 768
D_H1 = 512
D_H2 = 256
D_H3 = 64
H3_PAD = 128      # layer-3 width padded 64 -> 128 (lane-dense, MXU-K aligned)
OUT_PAD = 128     # final layer padded 10 -> 128 (unmasked lane-dense vst)
MAX_TILE_B = 512  # batch-tile cap (256-512 fills the v6e/v7x MXU per review)


def rating_head_kernel(x_ref, w1_ref, b1_ref, w2_ref, b2_ref,
                       w3_ref, b3_ref, w4_ref, b4_ref, o_ref):
    """Fused 4-layer MLP head on one (tile_b, 768) bf16 activation tile.

    Weights are bf16 (in, out); biases are f32 (1, out).  MXU operands are
    bf16 with f32 accumulation; bias-add / ReLU stay f32 on the VPU.
    """
    h = jnp.dot(x_ref[...], w1_ref[...],
                preferred_element_type=jnp.float32) + b1_ref[...]
    h = jnp.maximum(h, 0.0)                                   # F.relu

    h = jnp.dot(h.astype(jnp.bfloat16), w2_ref[...],
                preferred_element_type=jnp.float32) + b2_ref[...]
    h = jnp.maximum(h, 0.0)                                   # F.relu

    h = jnp.dot(h.astype(jnp.bfloat16), w3_ref[...],
                preferred_element_type=jnp.float32) + b3_ref[...]
    h = jnp.maximum(h, 0.0)                                   # F.relu (pad lanes stay 0)

    h = jnp.dot(h.astype(jnp.bfloat16), w4_ref[...],
                preferred_element_type=jnp.float32) + b4_ref[...]
    o_ref[...] = h.astype(o_ref.dtype)                        # no activation on last layer


def prepare_params(params):
    """One-time prep (outside the hot path).

    nn.Linear params (W: (out,in) f32, b: (out,) f32) -> kernel layout:
    W as (in, out) bf16, b as (1, out) f32.  Layer 3 is padded 64 -> 128 and
    layer 4 is padded (64,10) -> (128,128); all pad entries are ZERO (bias
    included) so ReLU keeps pad lanes at 0 and W4's zero pad rows absorb them.
    """
    (w1, b1), (w2, b2), (w3, b3), (w4, b4) = params

    def prep(w, b):
        return w.T.astype(jnp.bfloat16), b.reshape(1, -1).astype(jnp.float32)

    w1t, b1r = prep(w1, b1)
    w2t, b2r = prep(w2, b2)

    w3t = jnp.zeros((D_H2, H3_PAD), jnp.bfloat16).at[:, :D_H3].set(
        w3.T.astype(jnp.bfloat16))
    b3r = jnp.zeros((1, H3_PAD), jnp.float32).at[:, :D_H3].set(
        b3.reshape(1, -1).astype(jnp.float32))

    w4t = jnp.zeros((H3_PAD, OUT_PAD), jnp.bfloat16).at[:D_H3, :NUM_CLASSES].set(
        w4.T.astype(jnp.bfloat16))
    b4r = jnp.zeros((1, OUT_PAD), jnp.float32).at[:, :NUM_CLASSES].set(
        b4.reshape(1, -1).astype(jnp.float32))

    return (w1t, b1r, w2t, b2r, w3t, b3r, w4t, b4r)


def _round_up(n, m):
    return -(-n // m) * m


def _pick_tile_b(padded_b):
    """Batch tile: multiple of 16 (bf16 sublane tile), capped at MAX_TILE_B,
    and >= 2 tiles once the batch is big enough so v7x's two TensorCores both
    get work under dimension_semantics=("parallel",)."""
    if padded_b <= 32:
        return padded_b
    half = _round_up((padded_b + 1) // 2, 16)
    return min(MAX_TILE_B, half)


@jax.jit
def rating_model_forward(x_cls, prepped):
    """x_cls: (B, 768) CLS features from the frozen BERT (bf16 preferred).
    Returns (B, 10) f32 logits."""
    w1, b1, w2, b2, w3, b3, w4, b4 = prepped

    if x_cls.dtype != jnp.bfloat16:
        # In production, emit bf16 straight from the BERT output instead of a
        # standalone cast here (perf-review item).
        x_cls = x_cls.astype(jnp.bfloat16)

    B = x_cls.shape[0]
    # Pad only to the 16-row bf16 sublane granularity (<= 15 zero rows, cheap).
    # Any remaining raggedness vs. tile_b is handled by Pallas boundary masking
    # (OOB rows are never written back), so no full-tile HBM round-trip pad.
    Bp = _round_up(B, 16)
    if Bp != B:
        x_cls = jnp.pad(x_cls, ((0, Bp - B), (0, 0)))

    tile_b = _pick_tile_b(Bp)
    n_tiles = pl.cdiv(Bp, tile_b)

    const = lambda i: (0, 0)       # weights/biases: same block for every tile
    batched = lambda i: (i, 0)     # activations/output: tile along batch

    out_padded = pl.pallas_call(
        rating_head_kernel,
        out_shape=jax.ShapeDtypeStruct((Bp, OUT_PAD), jnp.float32),
        grid_spec=pltpu.PrefetchScalarGridSpec(
            num_scalar_prefetch=0,
            grid=(n_tiles,),
            in_specs=[
                pl.BlockSpec((tile_b, D_IN), batched),   # x (bf16)
                pl.BlockSpec((D_IN, D_H1), const),       # W1 (bf16)
                pl.BlockSpec((1, D_H1), const),          # b1 (f32)
                pl.BlockSpec((D_H1, D_H2), const),       # W2
                pl.BlockSpec((1, D_H2), const),          # b2
                pl.BlockSpec((D_H2, H3_PAD), const),     # W3 (padded 64->128)
                pl.BlockSpec((1, H3_PAD), const),        # b3 (zero-padded)
                pl.BlockSpec((H3_PAD, OUT_PAD), const),  # W4 (zero-padded)
                pl.BlockSpec((1, OUT_PAD), const),       # b4 (zero-padded)
            ],
            out_specs=pl.BlockSpec((tile_b, OUT_PAD), batched),
        ),
        compiler_params=pltpu.CompilerParams(
            dimension_semantics=("parallel",),
            vmem_limit_bytes=32 << 20,
        ),
    )(x_cls, w1, b1, w2, b2, w3, b3, w4, b4)

    return out_padded[:B, :NUM_CLASSES]


def init_params(key):
    """Deterministic init matching nn.Linear shapes: W is (out, in), b is (out,)."""
    dims = [(D_H1, D_IN), (D_H2, D_H1), (D_H3, D_H2), (NUM_CLASSES, D_H3)]
    params = []
    for i, (out_f, in_f) in enumerate(dims):
        kw, kb = jax.random.split(jax.random.fold_in(key, i))
        scale = 1.0 / jnp.sqrt(in_f)
        w = jax.random.uniform(kw, (out_f, in_f), jnp.float32, -scale, scale)
        b = jax.random.uniform(kb, (out_f,), jnp.float32, -scale, scale)
        params.append((w, b))
    return params


def reference_forward_matched(x_cls, prepped):
    """Plain-JAX reference mirroring the kernel numerics exactly
    (bf16 MXU operands, f32 accumulation, zero-padded layers 3/4)."""
    w1, b1, w2, b2, w3, b3, w4, b4 = prepped
    h = x_cls
    for i, (w, b) in enumerate(((w1, b1), (w2, b2), (w3, b3), (w4, b4))):
        h = jnp.dot(h.astype(jnp.bfloat16), w,
                    preferred_element_type=jnp.float32) + b
        if i < 3:
            h = jnp.maximum(h, 0.0)
    return h[:, :NUM_CLASSES]


def reference_forward_f32(x_f32, params):
    """Original-precision (f32, unpadded) head, matching the PyTorch module."""
    h = x_f32
    for i, (w, b) in enumerate(params):
        h = h @ w.T + b
        if i < 3:
            h = jnp.maximum(h, 0.0)
    return h


if __name__ == "__main__":
    key = jax.random.PRNGKey(0)
    k_x, k_p = jax.random.split(key)

    B = 8  # small batch
    # Synthetic stand-in for bert(**x)[0][:, 0, :]: CLS hidden state (B, 768),
    # emitted directly in bf16 (halves the dominant activation DMA stream).
    x_cls = jax.random.normal(k_x, (B, D_IN), dtype=jnp.float32).astype(jnp.bfloat16)
    params = init_params(k_p)
    prepped = prepare_params(params)   # one-time: transpose + bf16 cast + pad

    out = rating_model_forward(x_cls, prepped)
    out = jax.block_until_ready(out)
    assert out.shape == (B, NUM_CLASSES)
    assert bool(jnp.all(jnp.isfinite(out)))

    # (1) Validate against a reference with identical numerics (tight).
    ref = reference_forward_matched(x_cls, prepped)
    err = float(jnp.max(jnp.abs(out - ref)))
    assert jnp.allclose(out, ref, atol=2e-2, rtol=2e-2), err

    # (2) Validate against the original f32 head (PyTorch numerics) with a
    #     loose tolerance covering bf16 weight/activation quantization.
    ref32 = reference_forward_f32(x_cls.astype(jnp.float32), params)
    err32 = float(jnp.max(jnp.abs(out - ref32)))
    assert err32 < 0.2, err32

    print("KERNEL_OK")
</pallas_src>

<mosaic_0001>
module attributes {stable_mosaic.version = 11 : i64} {
  func.func @rating_head_kernel(%arg0: i32, %arg1: memref<16x768xbf16, #tpu.memory_space<vmem>>, %arg2: memref<768x512xbf16, #tpu.memory_space<vmem>>, %arg3: memref<1x512xf32, #tpu.memory_space<vmem>>, %arg4: memref<512x256xbf16, #tpu.memory_space<vmem>>, %arg5: memref<1x256xf32, #tpu.memory_space<vmem>>, %arg6: memref<256x128xbf16, #tpu.memory_space<vmem>>, %arg7: memref<1x128xf32, #tpu.memory_space<vmem>>, %arg8: memref<128x128xbf16, #tpu.memory_space<vmem>>, %arg9: memref<1x128xf32, #tpu.memory_space<vmem>>, %arg10: memref<16x128xf32, #tpu.memory_space<vmem>>) attributes {dimension_semantics = [#tpu.dimension_semantics<parallel>], iteration_bounds = array<i64: 1>, scalar_prefetch = 0 : i64, scratch_operands = 0 : i64, tpu.core_type = #tpu.core_type<tc>, window_params = [{transform_indices = @transform_0, window_bounds = array<i64: 16, 768>}, {pipeline_mode = #tpu.pipeline_mode<synchronous>, transform_indices = @transform_1, window_bounds = array<i64: 768, 512>}, {pipeline_mode = #tpu.pipeline_mode<synchronous>, transform_indices = @transform_2, window_bounds = array<i64: 1, 512>}, {pipeline_mode = #tpu.pipeline_mode<synchronous>, transform_indices = @transform_3, window_bounds = array<i64: 512, 256>}, {pipeline_mode = #tpu.pipeline_mode<synchronous>, transform_indices = @transform_4, window_bounds = array<i64: 1, 256>}, {pipeline_mode = #tpu.pipeline_mode<synchronous>, transform_indices = @transform_5, window_bounds = array<i64: 256, 128>}, {pipeline_mode = #tpu.pipeline_mode<synchronous>, transform_indices = @transform_6, window_bounds = array<i64: 1, 128>}, {pipeline_mode = #tpu.pipeline_mode<synchronous>, transform_indices = @transform_7, window_bounds = array<i64: 128, 128>}, {pipeline_mode = #tpu.pipeline_mode<synchronous>, transform_indices = @transform_8, window_bounds = array<i64: 1, 128>}, {transform_indices = @transform_9, window_bounds = array<i64: 16, 128>}]} {
    %c0 = arith.constant 0 : index
    %c0_0 = arith.constant 0 : index
    %0 = vector.load %arg1[%c0, %c0_0] : memref<16x768xbf16, #tpu.memory_space<vmem>>, vector<16x768xbf16>
    %c0_1 = arith.constant 0 : index
    %c0_2 = arith.constant 0 : index
    %1 = vector.load %arg2[%c0_1, %c0_2] : memref<768x512xbf16, #tpu.memory_space<vmem>>, vector<768x512xbf16>
    %cst = arith.constant dense<0.000000e+00> : vector<16x512xf32>
    %2 = tpu.matmul %0, %1, %cst {dimension_numbers = #tpu.dot_dimension_numbers<[1], [0], [0], [1], [0, 0, 1, 1], [], []>} : vector<16x768xbf16>, vector<768x512xbf16>, vector<16x512xf32> -> vector<16x512xf32>
    %c0_3 = arith.constant 0 : index
    %c0_4 = arith.constant 0 : index
    %3 = vector.load %arg3[%c0_3, %c0_4] : memref<1x512xf32, #tpu.memory_space<vmem>>, vector<1x512xf32>
    %4 = vector.broadcast %3 : vector<1x512xf32> to vector<16x512xf32>
    %5 = arith.addf %2, %4 : vector<16x512xf32>
    %cst_5 = arith.constant 0.000000e+00 : f32
    %6 = vector.broadcast %cst_5 : f32 to vector<16x512xf32>
    %7 = arith.maximumf %5, %6 : vector<16x512xf32>
    %8 = arith.truncf %7 : vector<16x512xf32> to vector<16x512xbf16>
    %c0_6 = arith.constant 0 : index
    %c0_7 = arith.constant 0 : index
    %9 = vector.load %arg4[%c0_6, %c0_7] : memref<512x256xbf16, #tpu.memory_space<vmem>>, vector<512x256xbf16>
    %cst_8 = arith.constant dense<0.000000e+00> : vector<16x256xf32>
    %10 = tpu.matmul %8, %9, %cst_8 {dimension_numbers = #tpu.dot_dimension_numbers<[1], [0], [0], [1], [0, 0, 1, 1], [], []>} : vector<16x512xbf16>, vector<512x256xbf16>, vector<16x256xf32> -> vector<16x256xf32>
    %c0_9 = arith.constant 0 : index
    %c0_10 = arith.constant 0 : index
    %11 = vector.load %arg5[%c0_9, %c0_10] : memref<1x256xf32, #tpu.memory_space<vmem>>, vector<1x256xf32>
    %12 = vector.broadcast %11 : vector<1x256xf32> to vector<16x256xf32>
    %13 = arith.addf %10, %12 : vector<16x256xf32>
    %cst_11 = arith.constant 0.000000e+00 : f32
    %14 = vector.broadcast %cst_11 : f32 to vector<16x256xf32>
    %15 = arith.maximumf %13, %14 : vector<16x256xf32>
    %16 = arith.truncf %15 : vector<16x256xf32> to vector<16x256xbf16>
    %c0_12 = arith.constant 0 : index
    %c0_13 = arith.constant 0 : index
    %17 = vector.load %arg6[%c0_12, %c0_13] : memref<256x128xbf16, #tpu.memory_space<vmem>>, vector<256x128xbf16>
    %cst_14 = arith.constant dense<0.000000e+00> : vector<16x128xf32>
    %18 = tpu.matmul %16, %17, %cst_14 {dimension_numbers = #tpu.dot_dimension_numbers<[1], [0], [0], [1], [0, 0, 1, 1], [], []>} : vector<16x256xbf16>, vector<256x128xbf16>, vector<16x128xf32> -> vector<16x128xf32>
    %c0_15 = arith.constant 0 : index
    %c0_16 = arith.constant 0 : index
    %19 = vector.load %arg7[%c0_15, %c0_16] : memref<1x128xf32, #tpu.memory_space<vmem>>, vector<1x128xf32>
    %20 = vector.broadcast %19 : vector<1x128xf32> to vector<16x128xf32>
    %21 = arith.addf %18, %20 : vector<16x128xf32>
    %cst_17 = arith.constant 0.000000e+00 : f32
    %22 = vector.broadcast %cst_17 : f32 to vector<16x128xf32>
    %23 = arith.maximumf %21, %22 : vector<16x128xf32>
    %24 = arith.truncf %23 : vector<16x128xf32> to vector<16x128xbf16>
    %c0_18 = arith.constant 0 : index
    %c0_19 = arith.constant 0 : index
    %25 = vector.load %arg8[%c0_18, %c0_19] : memref<128x128xbf16, #tpu.memory_space<vmem>>, vector<128x128xbf16>
    %cst_20 = arith.constant dense<0.000000e+00> : vector<16x128xf32>
    %26 = tpu.matmul %24, %25, %cst_20 {dimension_numbers = #tpu.dot_dimension_numbers<[1], [0], [0], [1], [0, 0, 1, 1], [], []>} : vector<16x128xbf16>, vector<128x128xbf16>, vector<16x128xf32> -> vector<16x128xf32>
    %c0_21 = arith.constant 0 : index
    %c0_22 = arith.constant 0 : index
    %27 = vector.load %arg9[%c0_21, %c0_22] : memref<1x128xf32, #tpu.memory_space<vmem>>, vector<1x128xf32>
    %28 = vector.broadcast %27 : vector<1x128xf32> to vector<16x128xf32>
    %29 = arith.addf %26, %28 : vector<16x128xf32>
    %c0_23 = arith.constant 0 : index
    %c0_24 = arith.constant 0 : index
    %30 = vector.load %arg10[%c0_23, %c0_24] : memref<16x128xf32, #tpu.memory_space<vmem>>, vector<16x128xf32>
    tpu.vector_store %arg10[%c0_23, %c0_24], %29 {strides = array<i32>} : memref<16x128xf32, #tpu.memory_space<vmem>>, vector<16x128xf32>,
    return
  }
  func.func @transform_0(%arg0: i32) -> (i32, i32) {
    %c0_i32 = arith.constant 0 : i32
    %c0_i32_0 = arith.constant 0 : i32
    return %arg0, %c0_i32 : i32, i32
  }
  func.func @transform_1(%arg0: i32) -> (i32, i32) {
    %c0_i32 = arith.constant 0 : i32
    %c0_i32_0 = arith.constant 0 : i32
    %c0_i32_1 = arith.constant 0 : i32
    return %c0_i32, %c0_i32_0 : i32, i32
  }
  func.func @transform_2(%arg0: i32) -> (i32, i32) {
    %c0_i32 = arith.constant 0 : i32
    %c0_i32_0 = arith.constant 0 : i32
    %c0_i32_1 = arith.constant 0 : i32
    return %c0_i32, %c0_i32_0 : i32, i32
  }
  func.func @transform_3(%arg0: i32) -> (i32, i32) {
    %c0_i32 = arith.constant 0 : i32
    %c0_i32_0 = arith.constant 0 : i32
    %c0_i32_1 = arith.constant 0 : i32
    return %c0_i32, %c0_i32_0 : i32, i32
  }
  func.func @transform_4(%arg0: i32) -> (i32, i32) {
    %c0_i32 = arith.constant 0 : i32
    %c0_i32_0 = arith.constant 0 : i32
    %c0_i32_1 = arith.constant 0 : i32
    return %c0_i32, %c0_i32_0 : i32, i32
  }
  func.func @transform_5(%arg0: i32) -> (i32, i32) {
    %c0_i32 = arith.constant 0 : i32
    %c0_i32_0 = arith.constant 0 : i32
    %c0_i32_1 = arith.constant 0 : i32
    return %c0_i32, %c0_i32_0 : i32, i32
  }
  func.func @transform_6(%arg0: i32) -> (i32, i32) {
    %c0_i32 = arith.constant 0 : i32
    %c0_i32_0 = arith.constant 0 : i32
    %c0_i32_1 = arith.constant 0 : i32
    return %c0_i32, %c0_i32_0 : i32, i32
  }
  func.func @transform_7(%arg0: i32) -> (i32, i32) {
    %c0_i32 = arith.constant 0 : i32
    %c0_i32_0 = arith.constant 0 : i32
    %c0_i32_1 = arith.constant 0 : i32
    return %c0_i32, %c0_i32_0 : i32, i32
  }
  func.func @transform_8(%arg0: i32) -> (i32, i32) {
    %c0_i32 = arith.constant 0 : i32
    %c0_i32_0 = arith.constant 0 : i32
    %c0_i32_1 = arith.constant 0 : i32
    return %c0_i32, %c0_i32_0 : i32, i32
  }
  func.func @transform_9(%arg0: i32) -> (i32, i32) {
    %c0_i32 = arith.constant 0 : i32
    %c0_i32_0 = arith.constant 0 : i32
    return %arg0, %c0_i32 : i32, i32
  }
}

</mosaic_0001>

<bundles_post_ra>
// kernel: rating_model_forward.1
= control target key start
LH: loop header
LB: loop body
LE: loop exit
PB: predicated region body
PF: predicated region fallthrough
CT: control target
= control target key end

     0   :  { %14 = vsyncpa [#allocation3], 0  ;;  %s4098_s0 = inlined_call_operand.vmem [shape: bf16[16,768], index: 0, kind: input, shape index: {}]   ;;  %s4099_s1 = inlined_call_operand.hbm [shape: bf16[768,512], index: 1, kind: input, shape index: {}]   ;;  %s4100_s2 = inlined_call_operand.vmem [shape: f32[1,512], index: 2, kind: input, shape index: {}]   ;;  %s4101_s3 = inlined_call_operand.hbm [shape: bf16[512,256], index: 3, kind: input, shape index: {}]   ;;  %s4102_s4 = inlined_call_operand.vmem [shape: f32[1,256], index: 4, kind: input, shape index: {}]   ;;  %s4103_s5 = inlined_call_operand.hbm [shape: bf16[256,128], index: 5, kind: input, shape index: {}]   ;;  %s4104_s6 = inlined_call_operand.vmem [shape: f32[1,128], index: 6, kind: input, shape index: {}]   ;;  %s4105_s7 = inlined_call_operand.vmem [shape: bf16[128,128], index: 7, kind: input, shape index: {}]   ;;  %s4106_s8 = inlined_call_operand.vmem [shape: f32[1,128], index: 8, kind: input, shape index: {}]   ;;  %s4107_s9 = inlined_call_operand.vmem [shape: f32[16,128], index: 9, kind: output, shape index: {}]  }
   0x1   :  { %15 = vsyncpa [#allocation5], 0  ;;  %s37_s11 = sshll.u32 %s4101_s3, 4  ;;  %s3903_s12 = smov [#allocation4]   ;;  %s38_s11 = int_to_ptr.hbm [resolvable:$true] %s37_s11 }
   0x2   :  { %s39_s13 = sshll.u32 %s3903_s12, 4  ;;  %s22_s16 = sshll.u32 %s4099_s1, 4  ;;  %s40_s13 = int_to_ptr.vmem [resolvable:$true] %s39_s13  ;;  %s23_s16 = int_to_ptr.hbm [resolvable:$true] %s22_s16 }
   0x3   :  { %s3904_s17 = smov 128   ;;  %s3905_s18 = smov 8  }
   0x4   :  { %45 = dma.hbm_to_vmem [thread:$0]  %s38_s11, 8192, %s40_s13, [#allocation5], %s3904_s17, %s3904_s17, %s3905_s18  }
   0x5   :  { %s3906_s19 = smov [#allocation2]   ;;  %s3907_s21 = smov 256  }
   0x6   :  { %s24_s20 = sshll.u32 %s3906_s19, 4  ;;  %s3908_s22 = smov 16   ;;  %s25_s20 = int_to_ptr.vmem [resolvable:$true] %s24_s20 }
   0x7   :  { %30 = dma.hbm_to_vmem [thread:$0]  %s23_s16, 24576, %s25_s20, [#allocation3], %s3907_s21, %s3907_s21, %s3908_s22  }
   0x8   :  { %s52_s24 = sshll.u32 %s4103_s5, 4  ;;  %s3909_s25 = smov [#allocation6]   ;;  %s53_s24 = int_to_ptr.hbm [resolvable:$true] %s52_s24 }
   0x9   :  { %s54_s26 = sshll.u32 %s3909_s25, 4  ;;  %s3910_s27 = smov 64   ;;  %s55_s26 = int_to_ptr.vmem [resolvable:$true] %s54_s26 }
   0xa   :  { %s3911_s1 = smov 4  }
   0xb   :  { %60 = dma.hbm_to_vmem [thread:$0]  %s53_s24, 2048, %s55_s26, [#allocation5], %s3910_s27, %s3910_s27, %s3911_s1  }
   0xc   :  { %3899 = dma.done.wait [#allocation3], 24576  }
   0xd   :  { %3900 = vsyncadd [#allocation3], 4294942720 }
   0xe   :  { %3901 = dma.done.wait [#allocation5], 10240  }
   0xf   :  { %3902 = vsyncadd [#allocation5], 4294957056  ;;  %v2524_v0 = vld [vmem:[#allocation2 + $0xe0] sm:$0xf]  ;;  %v3566_v1 = vld [vmem:[#allocation2 + $0xec] sm:$0xf0] }
  0x10   :  { %v2652_v2 = vld [vmem:[#allocation2 + $0x1e0] sm:$0xf]  ;;  %v2525_v3 = vor.u32 %v3566_v1, %v2524_v0  ;;  %v3598_v4 = vld [vmem:[#allocation2 + $0x1ec] sm:$0xf0] }
  0x11   :  { %v2780_v5 = vld [vmem:[#allocation2 + $0x2e0] sm:$0xf]  ;;  %v3630_v6 = vld [vmem:[#allocation2 + $0x2ec] sm:$0xf0]  ;;  %v2653_v7 = vor.u32 %v3598_v4, %v2652_v2 }
  0x12   :  { %v2781_v8 = vor.u32 %v3630_v6, %v2780_v5  ;;  %v2908_v9 = vld [vmem:[#allocation2 + $0x3e0] sm:$0xf]  ;;  %v3662_v10 = vld [vmem:[#allocation2 + $0x3ec] sm:$0xf0]  ;;  %1277 = vmatpush.bf16.msra.mxu0 %v2525_v3 }
  0x13   :  { %v2508_v11 = vld [vmem:[#allocation2 + $0xc0] sm:$0xf]  ;;  %v2909_v12 = vor.u32 %v3662_v10, %v2908_v9  ;;  %v3562_v13 = vld [vmem:[#allocation2 + $0xcc] sm:$0xf0]  ;;  %1291 = vmatpush.bf16.msra.mxu1 %v2653_v7 }
  0x14   :  { %v2636_v14 = vld [vmem:[#allocation2 + $0x1c0] sm:$0xf]  ;;  %v3594_v15 = vld [vmem:[#allocation2 + $0x1cc] sm:$0xf0]  ;;  %1305 = vmatpush.bf16.msra.mxu2 %v2781_v8  ;;  %v2509_v16 = vor.u32 %v3562_v13, %v2508_v11 }
  0x15   :  { %v2637_v17 = vor.u32 %v3594_v15, %v2636_v14  ;;  %v2764_v18 = vld [vmem:[#allocation2 + $0x2c0] sm:$0xf]  ;;  %v3626_v19 = vld [vmem:[#allocation2 + $0x2cc] sm:$0xf0]  ;;  %1319 = vmatpush.bf16.msra.mxu3 %v2909_v12 }
  0x16   :  { %v2892_v20 = vld [vmem:[#allocation2 + $0x3c0] sm:$0xf]  ;;  %v2765_v21 = vor.u32 %v3626_v19, %v2764_v18  ;;  %v3658_v22 = vld [vmem:[#allocation2 + $0x3cc] sm:$0xf0]  ;;  %1278 = vmatpush.bf16.msra.mxu0 %v2509_v16 }
  0x17   :  { %v2492_v23 = vld [vmem:[#allocation2 + $0xa0] sm:$0xf]  ;;  %v3558_v24 = vld [vmem:[#allocation2 + $0xac] sm:$0xf0]  ;;  %v2893_v25 = vor.u32 %v3658_v22, %v2892_v20  ;;  %1292 = vmatpush.bf16.msra.mxu1 %v2637_v17 }
  0x18   :  { %v2620_v26 = vld [vmem:[#allocation2 + $0x1a0] sm:$0xf]  ;;  %v3590_v27 = vld [vmem:[#allocation2 + $0x1ac] sm:$0xf0]  ;;  %v2493_v29 = vor.u32 %v3558_v24, %v2492_v23  ;;  %1306 = vmatpush.bf16.msra.mxu2 %v2765_v21 }
  0x19   :  { %v2748_v28 = vld [vmem:[#allocation2 + $0x2a0] sm:$0xf]  ;;  %v3622_v30 = vld [vmem:[#allocation2 + $0x2ac] sm:$0xf0]  ;;  %v2621_v33 = vor.u32 %v3590_v27, %v2620_v26  ;;  %1320 = vmatpush.bf16.msra.mxu3 %v2893_v25 }
  0x1a   :  { %v2876_v31 = vld [vmem:[#allocation2 + $0x3a0] sm:$0xf]  ;;  %v3654_v32 = vld [vmem:[#allocation2 + $0x3ac] sm:$0xf0]  ;;  %v2749_v34 = vor.u32 %v3622_v30, %v2748_v28  ;;  %1279 = vmatpush.bf16.msra.mxu0 %v2493_v29 }
  0x1b   :  { %v2476_v35 = vld [vmem:[#allocation2 + $0x80] sm:$0xf]  ;;  %v3554_v36 = vld [vmem:[#allocation2 + $0x8c] sm:$0xf0]  ;;  %v2877_v38 = vor.u32 %v3654_v32, %v2876_v31  ;;  %1293 = vmatpush.bf16.msra.mxu1 %v2621_v33  ;;  %v3564_v33 = vld [vmem:[#allocation2 + $0xe4] sm:$0xf] }
  0x1c   :  { %v2604_v37 = vld [vmem:[#allocation2 + $0x180] sm:$0xf]  ;;  %v3586_v39 = vld [vmem:[#allocation2 + $0x18c] sm:$0xf0]  ;;  %v2477_v44 = vor.u32 %v3554_v36, %v2476_v35  ;;  %1307 = vmatpush.bf16.msra.mxu2 %v2749_v34  ;;  %v2526_v34 = vld [vmem:[#allocation2 + $0xf0] sm:$0xf0] }
  0x1d   :  { %v2732_v40 = vld [vmem:[#allocation2 + $0x280] sm:$0xf]  ;;  %v3618_v41 = vld [vmem:[#allocation2 + $0x28c] sm:$0xf0]  ;;  %v2605_v45 = vor.u32 %v3586_v39, %v2604_v37  ;;  %1321 = vmatpush.bf16.msra.mxu3 %v2877_v38  ;;  %v3596_v37 = vld [vmem:[#allocation2 + $0x1e4] sm:$0xf] }
  0x1e   :  { %v2860_v42 = vld [vmem:[#allocation2 + $0x380] sm:$0xf]  ;;  %v3650_v43 = vld [vmem:[#allocation2 + $0x38c] sm:$0xf0]  ;;  %v2733_v46 = vor.u32 %v3618_v41, %v2732_v40  ;;  %1280 = vmatpush.bf16.msra.mxu0 %v2477_v44  ;;  %v2654_v38 = vld [vmem:[#allocation2 + $0x1f0] sm:$0xf0] }
  0x1f   :  { %v2460_v47 = vld [vmem:[#allocation2 + $0x60] sm:$0xf]  ;;  %v3550_v48 = vld [vmem:[#allocation2 + $0x6c] sm:$0xf0]  ;;  %v2861_v50 = vor.u32 %v3650_v43, %v2860_v42  ;;  %1294 = vmatpush.bf16.msra.mxu1 %v2605_v45  ;;  %v2529_v43 = vor.u32 %v3564_v33, %v2526_v34  ;;  %v2462_v33 = vld [vmem:[#allocation2 + $0x70] sm:$0xf0] }
  0x20   :  { %v2588_v49 = vld [vmem:[#allocation2 + $0x160] sm:$0xf]  ;;  %v3582_v51 = vld [vmem:[#allocation2 + $0x16c] sm:$0xf0]  ;;  %v2461_v56 = vor.u32 %v3550_v48, %v2460_v47  ;;  %1308 = vmatpush.bf16.msra.mxu2 %v2733_v46  ;;  %v2657_v47 = vor.u32 %v3596_v37, %v2654_v38  ;;  %v3560_v48 = vld [vmem:[#allocation2 + $0xc4] sm:$0xf] }
  0x21   :  { %v2716_v52 = vld [vmem:[#allocation2 + $0x260] sm:$0xf]  ;;  %v3614_v53 = vld [vmem:[#allocation2 + $0x26c] sm:$0xf0]  ;;  %v2589_v57 = vor.u32 %v3582_v51, %v2588_v49  ;;  %1322 = vmatpush.bf16.msra.mxu3 %v2861_v50  ;;  %v2510_v49 = vld [vmem:[#allocation2 + $0xd0] sm:$0xf0] }
  0x22   :  { %v2844_v54 = vld [vmem:[#allocation2 + $0x360] sm:$0xf]  ;;  %v3646_v55 = vld [vmem:[#allocation2 + $0x36c] sm:$0xf0]  ;;  %v2717_v58 = vor.u32 %v3614_v53, %v2716_v52  ;;  %1281 = vmatpush.bf16.msra.mxu0 %v2461_v56  ;;  %v3592_v50 = vld [vmem:[#allocation2 + $0x1c4] sm:$0xf] }
  0x23   :  { %v2444_v59 = vld [vmem:[#allocation2 + $0x40] sm:$0xf]  ;;  %v3546_v60 = vld [vmem:[#allocation2 + $0x4c] sm:$0xf0]  ;;  %v2845_v62 = vor.u32 %v3646_v55, %v2844_v54  ;;  %1295 = vmatpush.bf16.msra.mxu1 %v2589_v57  ;;  %v2638_v51 = vld [vmem:[#allocation2 + $0x1d0] sm:$0xf0] }
  0x24   :  { %v2572_v61 = vld [vmem:[#allocation2 + $0x140] sm:$0xf]  ;;  %v3578_v63 = vld [vmem:[#allocation2 + $0x14c] sm:$0xf0]  ;;  %v2445_v4 = vor.u32 %v3546_v60, %v2444_v59  ;;  %1309 = vmatpush.bf16.msra.mxu2 %v2717_v58  ;;  %v3533_v53 = vld [vmem:[%s4098_s0 + $0x14] sm:$0xf0]  ;;  %v2513_v59 = vor.u32 %v3560_v48, %v2510_v49 }
  0x25   :  { %v2700_v0 = vld [vmem:[#allocation2 + $0x240] sm:$0xf]  ;;  %v3610_v1 = vld [vmem:[#allocation2 + $0x24c] sm:$0xf0]  ;;  %v2573_v5 = vor.u32 %v3578_v63, %v2572_v61  ;;  %1323 = vmatpush.bf16.msra.mxu3 %v2845_v62  ;;  %v3556_v62 = vld [vmem:[#allocation2 + $0xa4] sm:$0xf]  ;;  %v2641_v63 = vor.u32 %v3592_v50, %v2638_v51 }
  0x26   :  { %v2828_v2 = vld [vmem:[#allocation2 + $0x340] sm:$0xf]  ;;  %v3642_v3 = vld [vmem:[#allocation2 + $0x34c] sm:$0xf0]  ;;  %v2701_v6 = vor.u32 %v3610_v1, %v2700_v0  ;;  %1282 = vmatpush.bf16.msra.mxu0 %v2445_v4  ;;  %v2494_v0 = vld [vmem:[#allocation2 + $0xb0] sm:$0xf0] }
  0x27   :  { %v2428_v7 = vld [vmem:[#allocation2 + $0x20] sm:$0xf]  ;;  %v3542_v8 = vld [vmem:[#allocation2 + $0x2c] sm:$0xf0]  ;;  %v2829_v10 = vor.u32 %v3642_v3, %v2828_v2  ;;  %1296 = vmatpush.bf16.msra.mxu1 %v2573_v5  ;;  %v3530_v1 = vld [vmem:[%s4098_s0 + $0x4] sm:$0xf] }
  0x28   :  { %v2556_v9 = vld [vmem:[#allocation2 + $0x120] sm:$0xf]  ;;  %v3574_v11 = vld [vmem:[#allocation2 + $0x12c] sm:$0xf0]  ;;  %v2429_v16 = vor.u32 %v3542_v8, %v2428_v7  ;;  %1310 = vmatpush.bf16.msra.mxu2 %v2701_v6  ;;  %v2390_v2 = vld [vmem:[%s4098_s0 + $0x18] sm:$0xf0] }
  0x29   :  { %v2684_v12 = vld [vmem:[#allocation2 + $0x220] sm:$0xf]  ;;  %v3606_v13 = vld [vmem:[#allocation2 + $0x22c] sm:$0xf0]  ;;  %v2557_v19 = vor.u32 %v3574_v11, %v2556_v9  ;;  %1324 = vmatpush.bf16.msra.mxu3 %v2829_v10  ;;  %v3588_v3 = vld [vmem:[#allocation2 + $0x1a4] sm:$0xf]  ;;  %v3986_v6 = vor.u32 %v3530_v1, %v2390_v2 }
  0x2a   :  { %v2812_v14 = vld [vmem:[#allocation2 + $0x320] sm:$0xf]  ;;  %v3638_v15 = vld [vmem:[#allocation2 + $0x32c] sm:$0xf0]  ;;  %v2685_v20 = vor.u32 %v3606_v13, %v2684_v12  ;;  %1283 = vmatpush.bf16.msra.mxu0 %v2429_v16  ;;  %v2622_v4 = vld [vmem:[#allocation2 + $0x1b0] sm:$0xf0]  ;;  %v2497_v12 = vor.u32 %v3556_v62, %v2494_v0 }
  0x2b   :  { %v2412_v17 = vld [vmem:[#allocation2] sm:$0xf]  ;;  %v3538_v18 = vld [vmem:[#allocation2 + $0xc] sm:$0xf0]  ;;  %v2813_v24 = vor.u32 %v3638_v15, %v2812_v14  ;;  %1297 = vmatpush.bf16.msra.mxu1 %v2557_v19  ;;  %v3552_v13 = vld [vmem:[#allocation2 + $0x84] sm:$0xf]  ;;  %v2625_v16 = vor.u32 %v3588_v3, %v2622_v4 }
  0x2c   :  { %v2540_v21 = vld [vmem:[#allocation2 + $0x100] sm:$0xf]  ;;  %v3570_v22 = vld [vmem:[#allocation2 + $0x10c] sm:$0xf0]  ;;  %v2413_v31 = vor.u32 %v3538_v18, %v2412_v17  ;;  %1311 = vmatpush.bf16.msra.mxu2 %v2685_v20  ;;  %v2478_v14 = vld [vmem:[#allocation2 + $0x90] sm:$0xf0] }
  0x2d   :  { %v2668_v23 = vld [vmem:[#allocation2 + $0x200] sm:$0xf]  ;;  %v3602_v25 = vld [vmem:[#allocation2 + $0x20c] sm:$0xf0]  ;;  %v2541_v35 = vor.u32 %v3570_v22, %v2540_v21  ;;  %1325 = vmatpush.bf16.msra.mxu3 %v2813_v24  ;;  %v2396_v15 = vld [vmem:[%s4098_s0 + $0x8] sm:$0xf] }
  0x2e   :  { %v2796_v26 = vld [vmem:[#allocation2 + $0x300] sm:$0xf]  ;;  %v3634_v27 = vld [vmem:[#allocation2 + $0x30c] sm:$0xf0]  ;;  %v2669_v36 = vor.u32 %v3602_v25, %v2668_v23  ;;  %1284 = vmatpush.bf16.msra.mxu0 %v2413_v31  ;;  %v3531_v18 = vld [vmem:[%s4098_s0 + $0xc] sm:$0xf] }
  0x2f   :  { %v3036_v28 = vld [vmem:[#allocation2 + $0x4e0] sm:$0xf]  ;;  %v3694_v29 = vld [vmem:[#allocation2 + $0x4ec] sm:$0xf0]  ;;  %v2797_v39 = vor.u32 %v3634_v27, %v2796_v26  ;;  %1298 = vmatpush.bf16.msra.mxu1 %v2541_v35  ;;  %v2398_v19 = vld [vmem:[%s4098_s0 + $0x20] sm:$0xf0]  ;;  %v2481_v26 = vor.u32 %v3552_v13, %v2478_v14 }
  0x30   :  { %v3164_v30 = vld [vmem:[#allocation2 + $0x5e0] sm:$0xf]  ;;  %v3726_v32 = vld [vmem:[#allocation2 + $0x5ec] sm:$0xf0]  ;;  %v3037_v40 = vor.u32 %v3694_v29, %v3036_v28  ;;  %1312 = vmatpush.bf16.msra.mxu2 %v2669_v36  ;;  %v3584_v20 = vld [vmem:[#allocation2 + $0x184] sm:$0xf]  ;;  %v4003_v23 = vor.u32 %v3531_v18, %v2398_v19 }
  0x31   :  { %v3020_v41 = vld [vmem:[#allocation2 + $0x4c0] sm:$0xf]  ;;  %v3165_v42 = vor.u32 %v3726_v32, %v3164_v30  ;;  %v3690_v44 = vld [vmem:[#allocation2 + $0x4cc] sm:$0xf0]  ;;  %1326 = vmatpush.bf16.msra.mxu3 %v2797_v39  ;;  %v2606_v21 = vld [vmem:[#allocation2 + $0x190] sm:$0xf0] }
  0x32   :  { %v3148_v45 = vld [vmem:[#allocation2 + $0x5c0] sm:$0xf]  ;;  %v3722_v46 = vld [vmem:[#allocation2 + $0x5cc] sm:$0xf0]  ;;  %1333 = vmatpush.bf16.msrb.mxu0 %v3037_v40  ;;  %v3021_v54 = vor.u32 %v3690_v44, %v3020_v41  ;;  %1299 = vmatmul.bf16.vlgmr.msra.gmra.mxu1 %v3986_v6  ;;  %v2609_v30 = vor.u32 %v3584_v20, %v2606_v21  ;;  %v3548_v32 = vld [vmem:[#allocation2 + $0x64] sm:$0xf] }
  0x33   :  { %v2388_v52 = vld [vmem:[%s4098_s0] sm:$0xf]  ;;  %v3686_v56 = vld [vmem:[#allocation2 + $0x4ac] sm:$0xf0]  ;;  %1347 = vmatpush.bf16.msrb.mxu1 %v3165_v42  ;;  %v3149_v58 = vor.u32 %v3722_v46, %v3148_v45  ;;  %v3580_v34 = vld [vmem:[#allocation2 + $0x164] sm:$0xf]  ;;  %v2465_v38 = vor.u32 %v3548_v32, %v2462_v33 }
  0x34   :  { %v3004_v55 = vld [vmem:[#allocation2 + $0x4a0] sm:$0xf]  ;;  %v3977_v57 = vor.u32 %v3533_v53, %v2388_v52  ;;  %1361 = vmatpush.bf16.msrb.mxu2 %v2529_v43  ;;  %v3718_v61 = vld [vmem:[#allocation2 + $0x5ac] sm:$0xf0]  ;;  %v2590_v35 = vld [vmem:[#allocation2 + $0x170] sm:$0xf0]  ;;  %1327 = vmatmul.bf16.vlgmr.msra.gmra.mxu3 %v4003_v23 }
  0x35   :  { %v3132_v60 = vld [vmem:[#allocation2 + $0x5a0] sm:$0xf]  ;;  %1375 = vmatpush.bf16.msrb.mxu3 %v2657_v47  ;;  %v3005_v7 = vor.u32 %v3686_v56, %v3004_v55  ;;  %v3682_v8 = vld [vmem:[#allocation2 + $0x48c] sm:$0xf0]  ;;  %v2593_v42 = vor.u32 %v3580_v34, %v2590_v35  ;;  %v3544_v44 = vld [vmem:[#allocation2 + $0x44] sm:$0xf] }
  0x36   :  { %1285 = vmatmul.bf16.vlgmr.msra.gmra.mxu0 %v3977_v57  ;;  %v2988_v5 = vld [vmem:[#allocation2 + $0x480] sm:$0xf]  ;;  %v3714_v10 = vld [vmem:[#allocation2 + $0x58c] sm:$0xf0]  ;;  %v3133_v11 = vor.u32 %v3718_v61, %v3132_v60  ;;  %v2446_v45 = vld [vmem:[#allocation2 + $0x50] sm:$0xf0] }
  0x37   :  { %1334 = vmatpush.bf16.msrb.mxu0 %v3021_v54  ;;  %v3116_v9 = vld [vmem:[#allocation2 + $0x580] sm:$0xf]  ;;  %1348 = vmatpush.bf16.msrb.mxu1 %v3149_v58  ;;  %v2989_v24 = vor.u32 %v3682_v8, %v2988_v5  ;;  %v3678_v28 = vld [vmem:[#allocation2 + $0x46c] sm:$0xf0]  ;;  %v3576_v46 = vld [vmem:[#allocation2 + $0x144] sm:$0xf]  ;;  %v2449_v50 = vor.u32 %v3544_v44, %v2446_v45 }
  0x38   :  { %1362 = vmatpush.bf16.msrb.mxu2 %v2513_v59  ;;  %v3534_v17 = vld [vmem:[%s4098_s0 + $0x1c] sm:$0xf0]  ;;  %v3117_v25 = vor.u32 %v3714_v10, %v3116_v9  ;;  %v3710_v31 = vld [vmem:[#allocation2 + $0x56c] sm:$0xf0]  ;;  %v2574_v47 = vld [vmem:[#allocation2 + $0x150] sm:$0xf0] }
  0x39   :  { %1376 = vmatpush.bf16.msrb.mxu3 %v2641_v63  ;;  %v4001_v22 = vor.u32 %v3534_v17, %v2396_v15  ;;  %v2972_v27 = vld [vmem:[#allocation2 + $0x460] sm:$0xf]  ;;  %v3674_v40 = vld [vmem:[#allocation2 + $0x44c] sm:$0xf0]  ;;  %v2577_v54 = vor.u32 %v3576_v46, %v2574_v47  ;;  %v3540_v56 = vld [vmem:[#allocation2 + $0x24] sm:$0xf] }
  0x3a   :  { %v3100_v29 = vld [vmem:[#allocation2 + $0x560] sm:$0xf]  ;;  %v2973_v36 = vor.u32 %v3678_v28, %v2972_v27  ;;  %v3706_v43 = vld [vmem:[#allocation2 + $0x54c] sm:$0xf0]  ;;  %v2430_v58 = vld [vmem:[#allocation2 + $0x30] sm:$0xf0] }
  0x3b   :  { %1335 = vmatpush.bf16.msrb.mxu0 %v3005_v7  ;;  %1349 = vmatpush.bf16.msrb.mxu1 %v3133_v11  ;;  %v3101_v37 = vor.u32 %v3710_v31, %v3100_v29  ;;  %v2956_v39 = vld [vmem:[#allocation2 + $0x440] sm:$0xf]  ;;  %v3670_v52 = vld [vmem:[#allocation2 + $0x42c] sm:$0xf0]  ;;  %v3572_v59 = vld [vmem:[#allocation2 + $0x124] sm:$0xf]  ;;  %v2433_v2 = vor.u32 %v3540_v56, %v2430_v58 }
  0x3c   :  { %1363 = vmatpush.bf16.msrb.mxu2 %v2497_v12  ;;  %v3084_v41 = vld [vmem:[#allocation2 + $0x540] sm:$0xf]  ;;  %v2957_v48 = vor.u32 %v3674_v40, %v2956_v39  ;;  %v3702_v55 = vld [vmem:[#allocation2 + $0x52c] sm:$0xf0]  ;;  %v2558_v60 = vld [vmem:[#allocation2 + $0x130] sm:$0xf0] }
  0x3d   :  { %1377 = vmatpush.bf16.msrb.mxu3 %v2625_v16  ;;  %1313 = vmatmul.bf16.vlgmr.msra.gmra.mxu2 %v4001_v22  ;;  %v3085_v49 = vor.u32 %v3706_v43, %v3084_v41  ;;  %v2940_v51 = vld [vmem:[#allocation2 + $0x420] sm:$0xf]  ;;  %v3666_v63 = vld [vmem:[#allocation2 + $0x40c] sm:$0xf0]  ;;  %v3536_v4 = vld [vmem:[#allocation2 + $0x4] sm:$0xf]  ;;  %v2561_v7 = vor.u32 %v3572_v59, %v2558_v60 }
  0x3e   :  { %v3068_v53 = vld [vmem:[#allocation2 + $0x520] sm:$0xf]  ;;  %v2941_v61 = vor.u32 %v3670_v52, %v2940_v51  ;;  %v3698_v3 = vld [vmem:[#allocation2 + $0x50c] sm:$0xf0]  ;;  %v2414_v5 = vld [vmem:[#allocation2 + $0x10] sm:$0xf0] }
  0x3f   :  { %1336 = vmatpush.bf16.msrb.mxu0 %v2989_v24  ;;  %1350 = vmatpush.bf16.msrb.mxu1 %v3117_v25  ;;  %v2924_v62 = vld [vmem:[#allocation2 + $0x400] sm:$0xf]  ;;  %v3069_v1 = vor.u32 %v3702_v55, %v3068_v53  ;;  %v3568_v8 = vld [vmem:[#allocation2 + $0x104] sm:$0xf]  ;;  %v2542_v9 = vld [vmem:[#allocation2 + $0x110] sm:$0xf0]  ;;  %v2417_v19 = vor.u32 %v3536_v4, %v2414_v5 }
  0x40   :  { %1364 = vmatpush.bf16.msrb.mxu2 %v2481_v26  ;;  %v3052_v0 = vld [vmem:[#allocation2 + $0x500] sm:$0xf]  ;;  %v3628_v10 = vld [vmem:[#allocation2 + $0x2e4] sm:$0xf]  ;;  %v2782_v11 = vld [vmem:[#allocation2 + $0x2f0] sm:$0xf0]  ;;  %v2925_v14 = vor.u32 %v3666_v63, %v2924_v62  ;;  %v2545_v25 = vor.u32 %v3568_v8, %v2542_v9 }
  0x41   :  { %1378 = vmatpush.bf16.msrb.mxu3 %v2609_v30  ;;  %v3660_v12 = vld [vmem:[#allocation2 + $0x3e4] sm:$0xf]  ;;  %v2910_v13 = vld [vmem:[#allocation2 + $0x3f0] sm:$0xf0]  ;;  %v3053_v18 = vor.u32 %v3698_v3, %v3052_v0  ;;  %v2404_v21 = vld [vmem:[%s4098_s0 + $0x10] sm:$0xf]  ;;  %v2785_v26 = vor.u32 %v3628_v10, %v2782_v11 }
  0x42   :  { %v3692_v15 = vld [vmem:[#allocation2 + $0x4e4] sm:$0xf]  ;;  %v3038_v16 = vld [vmem:[#allocation2 + $0x4f0] sm:$0xf0]  ;;  %v3535_v24 = vld [vmem:[%s4098_s0 + $0x24] sm:$0xf0]  ;;  %v2913_v29 = vor.u32 %v3660_v12, %v2910_v13 }
  0x43   :  { %1337 = vmatpush.bf16.msrb.mxu0 %v2973_v36  ;;  %1351 = vmatpush.bf16.msrb.mxu1 %v3101_v37  ;;  %v3724_v17 = vld [vmem:[#allocation2 + $0x5e4] sm:$0xf]  ;;  %v3166_v20 = vld [vmem:[#allocation2 + $0x5f0] sm:$0xf0]  ;;  %v2406_v28 = vld [vmem:[%s4098_s0 + $0x28] sm:$0xf0]  ;;  %v3041_v30 = vor.u32 %v3692_v15, %v3038_v16  ;;  %v4019_v35 = vor.u32 %v3535_v24, %v2404_v21 }
  0x44   :  { %1365 = vmatpush.bf16.msrb.mxu2 %v2465_v38  ;;  %v3532_v27 = vld [vmem:[%s4098_s0 + $0x14] sm:$0xf]  ;;  %v3624_v31 = vld [vmem:[#allocation2 + $0x2c4] sm:$0xf]  ;;  %v3169_v34 = vor.u32 %v3724_v17, %v3166_v20 }
  0x45   :  { %1379 = vmatpush.bf16.msrb.mxu3 %v2593_v42  ;;  %v2766_v32 = vld [vmem:[#allocation2 + $0x2d0] sm:$0xf0]  ;;  %v3656_v33 = vld [vmem:[#allocation2 + $0x3c4] sm:$0xf]  ;;  %v4021_v39 = vor.u32 %v3532_v27, %v2406_v28 }
  0x46   :  { %v2894_v36 = vld [vmem:[#allocation2 + $0x3d0] sm:$0xf0]  ;;  %v3688_v37 = vld [vmem:[#allocation2 + $0x4c4] sm:$0xf]  ;;  %v2769_v42 = vor.u32 %v3624_v31, %v2766_v32 }
  0x47   :  { %1338 = vmatpush.bf16.msrb.mxu0 %v2957_v48  ;;  %1352 = vmatpush.bf16.msrb.mxu1 %v3085_v49  ;;  %v3022_v38 = vld [vmem:[#allocation2 + $0x4d0] sm:$0xf0]  ;;  %v3720_v40 = vld [vmem:[#allocation2 + $0x5c4] sm:$0xf]  ;;  %v2897_v43 = vor.u32 %v3656_v33, %v2894_v36 }
  0x48   :  { %1366 = vmatpush.bf16.msrb.mxu2 %v2449_v50  ;;  %v3150_v41 = vld [vmem:[#allocation2 + $0x5d0] sm:$0xf0]  ;;  %v3025_v44 = vor.u32 %v3688_v37, %v3022_v38  ;;  %v3620_v45 = vld [vmem:[#allocation2 + $0x2a4] sm:$0xf] }
  0x49   :  { %1380 = vmatpush.bf16.msrb.mxu3 %v2577_v54  ;;  %v2750_v46 = vld [vmem:[#allocation2 + $0x2b0] sm:$0xf0]  ;;  %v3652_v47 = vld [vmem:[#allocation2 + $0x3a4] sm:$0xf]  ;;  %v3153_v48 = vor.u32 %v3720_v40, %v3150_v41 }
  0x4a   :  { %v2878_v49 = vld [vmem:[#allocation2 + $0x3b0] sm:$0xf0]  ;;  %v3684_v50 = vld [vmem:[#allocation2 + $0x4a4] sm:$0xf]  ;;  %v2753_v54 = vor.u32 %v3620_v45, %v2750_v46 }
  0x4b   :  { %1339 = vmatpush.bf16.msrb.mxu0 %v2941_v61  ;;  %1353 = vmatpush.bf16.msrb.mxu1 %v3069_v1  ;;  %v3006_v51 = vld [vmem:[#allocation2 + $0x4b0] sm:$0xf0]  ;;  %v3716_v52 = vld [vmem:[#allocation2 + $0x5a4] sm:$0xf]  ;;  %v2881_v55 = vor.u32 %v3652_v47, %v2878_v49 }
  0x4c   :  { %1367 = vmatpush.bf16.msrb.mxu2 %v2433_v2  ;;  %v3134_v53 = vld [vmem:[#allocation2 + $0x5b0] sm:$0xf0]  ;;  %v3009_v56 = vor.u32 %v3684_v50, %v3006_v51  ;;  %v3616_v58 = vld [vmem:[#allocation2 + $0x284] sm:$0xf] }
  0x4d   :  { %1381 = vmatpush.bf16.msrb.mxu3 %v2561_v7  ;;  %v2734_v59 = vld [vmem:[#allocation2 + $0x290] sm:$0xf0]  ;;  %v3648_v60 = vld [vmem:[#allocation2 + $0x384] sm:$0xf]  ;;  %v3137_v61 = vor.u32 %v3716_v52, %v3134_v53 }
  0x4e   :  { %v2862_v62 = vld [vmem:[#allocation2 + $0x390] sm:$0xf0]  ;;  %v3680_v63 = vld [vmem:[#allocation2 + $0x484] sm:$0xf]  ;;  %v2737_v3 = vor.u32 %v3616_v58, %v2734_v59  ;;  %v3567_v58 = vld [vmem:[#allocation2 + $0xf4] sm:$0xf0] }
  0x4f   :  { %1340 = vmatpush.bf16.msrb.mxu0 %v2925_v14  ;;  %1354 = vmatpush.bf16.msrb.mxu1 %v3053_v18  ;;  %v2990_v0 = vld [vmem:[#allocation2 + $0x490] sm:$0xf0]  ;;  %v3712_v1 = vld [vmem:[#allocation2 + $0x584] sm:$0xf]  ;;  %v2865_v4 = vor.u32 %v3648_v60, %v2862_v62  ;;  %v2660_v59 = vld [vmem:[#allocation2 + $0x1e8] sm:$0xf] }
  0x50   :  { %1368 = vmatpush.bf16.msrb.mxu2 %v2417_v19  ;;  %v3118_v2 = vld [vmem:[#allocation2 + $0x590] sm:$0xf0]  ;;  %v2993_v5 = vor.u32 %v3680_v63, %v2990_v0  ;;  %v3612_v7 = vld [vmem:[#allocation2 + $0x264] sm:$0xf]  ;;  %v3599_v60 = vld [vmem:[#allocation2 + $0x1f4] sm:$0xf0] }
  0x51   :  { %1382 = vmatpush.bf16.msrb.mxu3 %v2545_v25  ;;  %v2718_v8 = vld [vmem:[#allocation2 + $0x270] sm:$0xf0]  ;;  %v3644_v9 = vld [vmem:[#allocation2 + $0x364] sm:$0xf]  ;;  %v3121_v10 = vor.u32 %v3712_v1, %v3118_v2  ;;  %v2788_v62 = vld [vmem:[#allocation2 + $0x2e8] sm:$0xf] }
  0x52   :  { %1341 = vmatmul.bf16.vlgmr.msrb.gmra.mxu0 %v4019_v35  ;;  %1355 = vmatmul.bf16.vlgmr.msrb.gmra.mxu1 %v4021_v39  ;;  %v2846_v11 = vld [vmem:[#allocation2 + $0x370] sm:$0xf0]  ;;  %v3676_v12 = vld [vmem:[#allocation2 + $0x464] sm:$0xf]  ;;  %v2721_v16 = vor.u32 %v3612_v7, %v2718_v8  ;;  %v3631_v63 = vld [vmem:[#allocation2 + $0x2f4] sm:$0xf0]  ;;  %v2661_v7 = vor.u32 %v3599_v60, %v2660_v59 }
  0x53   :  { %1389 = vmatpush.bf16.msra.mxu0 %v2785_v26  ;;  %1403 = vmatpush.bf16.msra.mxu1 %v2913_v29  ;;  %v2974_v13 = vld [vmem:[#allocation2 + $0x470] sm:$0xf0]  ;;  %v3708_v14 = vld [vmem:[#allocation2 + $0x564] sm:$0xf]  ;;  %v2849_v17 = vor.u32 %v3644_v9, %v2846_v11  ;;  %v2916_v2 = vld [vmem:[#allocation2 + $0x3e8] sm:$0xf]  ;;  %v2789_v8 = vor.u32 %v3631_v63, %v2788_v62 }
  0x54   :  { %1417 = vmatpush.bf16.msra.mxu2 %v3041_v30  ;;  %1383 = vmatmul.bf16.vlgmr.msrb.gmra.mxu3 %v3986_v6  ;;  %v3102_v15 = vld [vmem:[#allocation2 + $0x570] sm:$0xf0]  ;;  %v2977_v18 = vor.u32 %v3676_v12, %v2974_v13  ;;  %v3608_v19 = vld [vmem:[#allocation2 + $0x244] sm:$0xf]  ;;  %v2516_v9 = vld [vmem:[#allocation2 + $0xc8] sm:$0xf] }
  0x55   :  { %1431 = vmatpush.bf16.msra.mxu3 %v3169_v34  ;;  %1369 = vmatmul.bf16.vlgmr.msrb.gmra.mxu2 %v3977_v57  ;;  %v2702_v20 = vld [vmem:[#allocation2 + $0x250] sm:$0xf0]  ;;  %v3640_v21 = vld [vmem:[#allocation2 + $0x344] sm:$0xf]  ;;  %v3105_v24 = vor.u32 %v3708_v14, %v3102_v15  ;;  %v2644_v11 = vld [vmem:[#allocation2 + $0x1c8] sm:$0xf] }
  0x56   :  { %v2830_v25 = vld [vmem:[#allocation2 + $0x350] sm:$0xf0]  ;;  %v3672_v26 = vld [vmem:[#allocation2 + $0x444] sm:$0xf]  ;;  %v2705_v30 = vor.u32 %v3608_v19, %v2702_v20  ;;  %v3595_v13 = vld [vmem:[#allocation2 + $0x1d4] sm:$0xf0] }
  0x57   :  { %1390 = vmatpush.bf16.msra.mxu0 %v2769_v42  ;;  %1404 = vmatpush.bf16.msra.mxu1 %v2897_v43  ;;  %v2958_v27 = vld [vmem:[#allocation2 + $0x450] sm:$0xf0]  ;;  %v3704_v28 = vld [vmem:[#allocation2 + $0x544] sm:$0xf]  ;;  %v2833_v31 = vor.u32 %v3640_v21, %v2830_v25  ;;  %v2772_v14 = vld [vmem:[#allocation2 + $0x2c8] sm:$0xf]  ;;  %v2645_v19 = vor.u32 %v3595_v13, %v2644_v11 }
  0x58   :  { %1418 = vmatpush.bf16.msra.mxu2 %v3025_v44  ;;  %v3086_v29 = vld [vmem:[#allocation2 + $0x550] sm:$0xf0]  ;;  %v2961_v32 = vor.u32 %v3672_v26, %v2958_v27  ;;  %v3604_v33 = vld [vmem:[#allocation2 + $0x224] sm:$0xf]  ;;  %v3627_v15 = vld [vmem:[#allocation2 + $0x2d4] sm:$0xf0] }
  0x59   :  { %1432 = vmatpush.bf16.msra.mxu3 %v3153_v48  ;;  %v2686_v34 = vld [vmem:[#allocation2 + $0x230] sm:$0xf0]  ;;  %v3636_v36 = vld [vmem:[#allocation2 + $0x324] sm:$0xf]  ;;  %v3089_v37 = vor.u32 %v3704_v28, %v3086_v29  ;;  %v2773_v20 = vor.u32 %v3627_v15, %v2772_v14  ;;  %v2500_v21 = vld [vmem:[#allocation2 + $0xa8] sm:$0xf] }
  0x5a   :  { %v2814_v38 = vld [vmem:[#allocation2 + $0x330] sm:$0xf0]  ;;  %v3668_v40 = vld [vmem:[#allocation2 + $0x424] sm:$0xf]  ;;  %v2689_v45 = vor.u32 %v3604_v33, %v2686_v34  ;;  %v2628_v25 = vld [vmem:[#allocation2 + $0x1a8] sm:$0xf] }
  0x5b   :  { %1391 = vmatpush.bf16.msra.mxu0 %v2753_v54  ;;  %1405 = vmatpush.bf16.msra.mxu1 %v2881_v55  ;;  %v2942_v41 = vld [vmem:[#allocation2 + $0x430] sm:$0xf0]  ;;  %v3700_v42 = vld [vmem:[#allocation2 + $0x524] sm:$0xf]  ;;  %v2817_v49 = vor.u32 %v3636_v36, %v2814_v38  ;;  %v3591_v27 = vld [vmem:[#allocation2 + $0x1b4] sm:$0xf0] }
  0x5c   :  { %1419 = vmatpush.bf16.msra.mxu2 %v3009_v56  ;;  %v3070_v43 = vld [vmem:[#allocation2 + $0x530] sm:$0xf0]  ;;  %v3600_v44 = vld [vmem:[#allocation2 + $0x204] sm:$0xf]  ;;  %v2945_v50 = vor.u32 %v3668_v40, %v2942_v41  ;;  %v2532_v56 = vld [vmem:[#allocation2 + $0xe8] sm:$0xf]  ;;  %v2629_v33 = vor.u32 %v3591_v27, %v2628_v25 }
  0x5d   :  { %1433 = vmatpush.bf16.msra.mxu3 %v3137_v61  ;;  %v2670_v46 = vld [vmem:[#allocation2 + $0x210] sm:$0xf0]  ;;  %v3632_v47 = vld [vmem:[#allocation2 + $0x304] sm:$0xf]  ;;  %v3073_v54 = vor.u32 %v3700_v42, %v3070_v43  ;;  %v2756_v28 = vld [vmem:[#allocation2 + $0x2a8] sm:$0xf] }
  0x5e   :  { %v2798_v48 = vld [vmem:[#allocation2 + $0x310] sm:$0xf0]  ;;  %v3664_v51 = vld [vmem:[#allocation2 + $0x404] sm:$0xf]  ;;  %v2673_v61 = vor.u32 %v3600_v44, %v2670_v46  ;;  %v3623_v29 = vld [vmem:[#allocation2 + $0x2b4] sm:$0xf0] }
  0x5f   :  { %1392 = vmatpush.bf16.msra.mxu0 %v2737_v3  ;;  %1406 = vmatpush.bf16.msra.mxu1 %v2865_v4  ;;  %v2926_v52 = vld [vmem:[#allocation2 + $0x410] sm:$0xf0]  ;;  %v3696_v53 = vld [vmem:[#allocation2 + $0x504] sm:$0xf]  ;;  %v2801_v0 = vor.u32 %v3632_v47, %v2798_v48  ;;  %v3663_v3 = vld [vmem:[#allocation2 + $0x3f4] sm:$0xf0]  ;;  %v2757_v34 = vor.u32 %v3623_v29, %v2756_v28 }
  0x60   :  { %1420 = vmatpush.bf16.msra.mxu2 %v2993_v5  ;;  %v3054_v55 = vld [vmem:[#allocation2 + $0x510] sm:$0xf0]  ;;  %v2929_v1 = vor.u32 %v3664_v51, %v2926_v52  ;;  %v2533_v5 = vor.u32 %v3567_v58, %v2532_v56  ;;  %v2917_v12 = vor.u32 %v3663_v3, %v2916_v2  ;;  %v2484_v36 = vld [vmem:[#allocation2 + $0x88] sm:$0xf]  ;;  %v3587_v41 = vld [vmem:[#allocation2 + $0x194] sm:$0xf0] }
  0x61   :  { %1434 = vmatpush.bf16.msra.mxu3 %v3121_v10  ;;  %v3057_v4 = vor.u32 %v3696_v53, %v3054_v55  ;;  %v3563_v10 = vld [vmem:[#allocation2 + $0xd4] sm:$0xf0]  ;;  %v2612_v38 = vld [vmem:[#allocation2 + $0x188] sm:$0xf] }
  0x62   :  { %v2740_v42 = vld [vmem:[#allocation2 + $0x288] sm:$0xf]  ;;  %v3619_v43 = vld [vmem:[#allocation2 + $0x294] sm:$0xf0]  ;;  %v2613_v47 = vor.u32 %v3587_v41, %v2612_v38  ;;  %v3565_v41 = vld [vmem:[#allocation2 + $0xec] sm:$0xf] }
  0x63   :  { %1393 = vmatpush.bf16.msra.mxu0 %v2721_v16  ;;  %1407 = vmatpush.bf16.msra.mxu1 %v2849_v17  ;;  %v2900_v16 = vld [vmem:[#allocation2 + $0x3c8] sm:$0xf]  ;;  %v3659_v17 = vld [vmem:[#allocation2 + $0x3d4] sm:$0xf0]  ;;  %v2741_v48 = vor.u32 %v3619_v43, %v2740_v42  ;;  %v2534_v42 = vld [vmem:[#allocation2 + $0xf8] sm:$0xf0] }
  0x64   :  { %1421 = vmatpush.bf16.msra.mxu2 %v2977_v18  ;;  %v2517_v18 = vor.u32 %v3563_v10, %v2516_v9  ;;  %v2901_v26 = vor.u32 %v3659_v17, %v2900_v16  ;;  %v2868_v44 = vld [vmem:[#allocation2 + $0x388] sm:$0xf]  ;;  %v3583_v53 = vld [vmem:[#allocation2 + $0x174] sm:$0xf0] }
  0x65   :  { %1435 = vmatpush.bf16.msra.mxu3 %v3105_v24  ;;  %v3559_v24 = vld [vmem:[#allocation2 + $0xb4] sm:$0xf0]  ;;  %v2596_v51 = vld [vmem:[#allocation2 + $0x168] sm:$0xf] }
  0x66   :  { %v3615_v55 = vld [vmem:[#allocation2 + $0x274] sm:$0xf0]  ;;  %v2852_v56 = vld [vmem:[#allocation2 + $0x368] sm:$0xf]  ;;  %v2597_v60 = vor.u32 %v3583_v53, %v2596_v51 }
  0x67   :  { %1394 = vmatpush.bf16.msra.mxu0 %v2705_v30  ;;  %1408 = vmatpush.bf16.msra.mxu1 %v2833_v31  ;;  %v2884_v30 = vld [vmem:[#allocation2 + $0x3a8] sm:$0xf]  ;;  %v3655_v31 = vld [vmem:[#allocation2 + $0x3b4] sm:$0xf0] }
  0x68   :  { %1422 = vmatpush.bf16.msra.mxu2 %v2961_v32  ;;  %v2501_v32 = vor.u32 %v3559_v24, %v2500_v21  ;;  %v2885_v40 = vor.u32 %v3655_v31, %v2884_v30  ;;  %v3647_v58 = vld [vmem:[#allocation2 + $0x374] sm:$0xf0]  ;;  %v2452_v62 = vld [vmem:[#allocation2 + $0x48] sm:$0xf] }
  0x69   :  { %1436 = vmatpush.bf16.msra.mxu3 %v3089_v37  ;;  %v3555_v37 = vld [vmem:[#allocation2 + $0x94] sm:$0xf0]  ;;  %v2708_v3 = vld [vmem:[#allocation2 + $0x248] sm:$0xf] }
  0x6a   :  { %v2485_v46 = vor.u32 %v3555_v37, %v2484_v36  ;;  %v3547_v63 = vld [vmem:[#allocation2 + $0x54] sm:$0xf0]  ;;  %v2436_v11 = vld [vmem:[#allocation2 + $0x28] sm:$0xf] }
  0x6b   :  { %1395 = vmatpush.bf16.msra.mxu0 %v2689_v45  ;;  %1409 = vmatpush.bf16.msra.mxu1 %v2817_v49  ;;  %v3651_v45 = vld [vmem:[#allocation2 + $0x394] sm:$0xf0]  ;;  %v2468_v49 = vld [vmem:[#allocation2 + $0x68] sm:$0xf] }
  0x6c   :  { %1423 = vmatpush.bf16.msra.mxu2 %v2945_v50  ;;  %v3551_v50 = vld [vmem:[#allocation2 + $0x74] sm:$0xf0]  ;;  %v2869_v52 = vor.u32 %v3651_v45, %v2868_v44  ;;  %v2564_v13 = vld [vmem:[#allocation2 + $0x128] sm:$0xf]  ;;  %v3597_v45 = vld [vmem:[#allocation2 + $0x1ec] sm:$0xf] }
  0x6d   :  { %1437 = vmatpush.bf16.msra.mxu3 %v3073_v54  ;;  %v2724_v54 = vld [vmem:[#allocation2 + $0x268] sm:$0xf]  ;;  %v2469_v59 = vor.u32 %v3551_v50, %v2468_v49  ;;  %v3579_v2 = vld [vmem:[#allocation2 + $0x154] sm:$0xf0]  ;;  %v2537_v50 = vor.u32 %v3565_v41, %v2534_v42 }
  0x6e   :  { %v3575_v15 = vld [vmem:[#allocation2 + $0x134] sm:$0xf0]  ;;  %v2692_v16 = vld [vmem:[#allocation2 + $0x228] sm:$0xf] }
  0x6f   :  { %1396 = vmatpush.bf16.msra.mxu0 %v2673_v61  ;;  %1410 = vmatpush.bf16.msra.mxu1 %v2801_v0  ;;  %v2725_v61 = vor.u32 %v3615_v55, %v2724_v54  ;;  %v2580_v0 = vld [vmem:[#allocation2 + $0x148] sm:$0xf]  ;;  %v3607_v17 = vld [vmem:[#allocation2 + $0x234] sm:$0xf0]  ;;  %v2565_v25 = vor.u32 %v3575_v15, %v2564_v13 }
  0x70   :  { %1424 = vmatpush.bf16.msra.mxu2 %v2929_v1  ;;  %v2853_v1 = vor.u32 %v3647_v58, %v2852_v56  ;;  %v2581_v9 = vor.u32 %v3579_v2, %v2580_v0  ;;  %v2420_v21 = vld [vmem:[#allocation2 + $0x8] sm:$0xf]  ;;  %v3539_v24 = vld [vmem:[#allocation2 + $0x14] sm:$0xf0]  ;;  %v3561_v56 = vld [vmem:[#allocation2 + $0xcc] sm:$0xf] }
  0x71   :  { %1438 = vmatpush.bf16.msra.mxu3 %v3057_v4  ;;  %v3611_v4 = vld [vmem:[#allocation2 + $0x254] sm:$0xf0]  ;;  %v2548_v27 = vld [vmem:[#allocation2 + $0x108] sm:$0xf]  ;;  %v2421_v38 = vor.u32 %v3539_v24, %v2420_v21  ;;  %v2518_v58 = vld [vmem:[#allocation2 + $0xd8] sm:$0xf0] }
  0x72   :  { %1397 = vmatmul.bf16.vlgmr.msra.gmra.mxu0 %v4001_v22  ;;  %1411 = vmatmul.bf16.vlgmr.msra.gmra.mxu1 %v4003_v23  ;;  %v2709_v10 = vor.u32 %v3611_v4, %v2708_v3  ;;  %v3571_v28 = vld [vmem:[#allocation2 + $0x114] sm:$0xf0]  ;;  %v2676_v29 = vld [vmem:[#allocation2 + $0x208] sm:$0xf]  ;;  %v2614_v21 = vld [vmem:[#allocation2 + $0x198] sm:$0xf0] }
  0x73   :  { %1445 = vmatpush.bf16.msrb.mxu0 %v2533_v5  ;;  %1459 = vmatpush.bf16.msrb.mxu1 %v2661_v7  ;;  %v2836_v5 = vld [vmem:[#allocation2 + $0x348] sm:$0xf]  ;;  %v3643_v7 = vld [vmem:[#allocation2 + $0x354] sm:$0xf0]  ;;  %v2549_v43 = vor.u32 %v3571_v28, %v2548_v27 }
  0x74   :  { %1473 = vmatpush.bf16.msrb.mxu2 %v2789_v8  ;;  %1439 = vmatmul.bf16.vlgmr.msra.gmra.mxu3 %v4021_v39  ;;  %v2453_v8 = vor.u32 %v3547_v63, %v2452_v62  ;;  %v2837_v14 = vor.u32 %v3643_v7, %v2836_v5  ;;  %v3603_v31 = vld [vmem:[#allocation2 + $0x214] sm:$0xf0]  ;;  %v3172_v37 = vld [vmem:[#allocation2 + $0x5e8] sm:$0xf]  ;;  %v2521_v63 = vor.u32 %v3561_v56, %v2518_v58  ;;  %v3557_v5 = vld [vmem:[#allocation2 + $0xac] sm:$0xf] }
  0x75   :  { %1487 = vmatpush.bf16.msrb.mxu3 %v2917_v12  ;;  %1425 = vmatmul.bf16.vlgmr.msra.gmra.mxu2 %v4019_v35  ;;  %v3543_v12 = vld [vmem:[#allocation2 + $0x34] sm:$0xf0]  ;;  %v2677_v44 = vor.u32 %v3603_v31, %v2676_v29  ;;  %v3028_v51 = vld [vmem:[#allocation2 + $0x4c8] sm:$0xf]  ;;  %v2502_v7 = vld [vmem:[#allocation2 + $0xb8] sm:$0xf0] }
  0x76   :  { %v3695_v36 = vld [vmem:[#allocation2 + $0x4f4] sm:$0xf0]  ;;  %v3156_v53 = vld [vmem:[#allocation2 + $0x5c8] sm:$0xf] }
  0x77   :  { %1446 = vmatpush.bf16.msrb.mxu0 %v2517_v18  ;;  %1460 = vmatpush.bf16.msrb.mxu1 %v2645_v19  ;;  %v2820_v18 = vld [vmem:[#allocation2 + $0x328] sm:$0xf]  ;;  %v3639_v19 = vld [vmem:[#allocation2 + $0x334] sm:$0xf0] }
  0x78   :  { %1474 = vmatpush.bf16.msrb.mxu2 %v2773_v20  ;;  %v2437_v20 = vor.u32 %v3543_v12, %v2436_v11  ;;  %v2821_v30 = vor.u32 %v3639_v19, %v2820_v18  ;;  %v3723_v55 = vld [vmem:[#allocation2 + $0x5d4] sm:$0xf0]  ;;  %v3012_v0 = vld [vmem:[#allocation2 + $0x4a8] sm:$0xf]  ;;  %v2505_v12 = vor.u32 %v3557_v5, %v2502_v7  ;;  %v3553_v18 = vld [vmem:[#allocation2 + $0x8c] sm:$0xf] }
  0x79   :  { %1488 = vmatpush.bf16.msrb.mxu3 %v2901_v26  ;;  %v2693_v26 = vor.u32 %v3607_v17, %v2692_v16  ;;  %v3157_v62 = vor.u32 %v3723_v55, %v3156_v53  ;;  %v3140_v2 = vld [vmem:[#allocation2 + $0x5a8] sm:$0xf]  ;;  %v3719_v4 = vld [vmem:[#allocation2 + $0x5b4] sm:$0xf0]  ;;  %v2486_v19 = vld [vmem:[#allocation2 + $0x98] sm:$0xf0] }
  0x7a   :  { %v3141_v11 = vor.u32 %v3719_v4, %v3140_v2  ;;  %v2996_v13 = vld [vmem:[#allocation2 + $0x488] sm:$0xf]  ;;  %v3715_v17 = vld [vmem:[#allocation2 + $0x594] sm:$0xf0]  ;;  %v3537_v7 = vld [vmem:[#allocation2 + $0xc] sm:$0xf] }
  0x7b   :  { %1447 = vmatpush.bf16.msrb.mxu0 %v2501_v32  ;;  %1461 = vmatpush.bf16.msrb.mxu1 %v2629_v33  ;;  %v2804_v32 = vld [vmem:[#allocation2 + $0x308] sm:$0xf]  ;;  %v3635_v33 = vld [vmem:[#allocation2 + $0x314] sm:$0xf0] }
  0x7c   :  { %1475 = vmatpush.bf16.msrb.mxu2 %v2757_v34  ;;  %v3044_v34 = vld [vmem:[#allocation2 + $0x4e8] sm:$0xf]  ;;  %v3679_v28 = vld [vmem:[#allocation2 + $0x474] sm:$0xf0] }
  0x7d   :  { %1489 = vmatpush.bf16.msrb.mxu3 %v2885_v40  ;;  %v3727_v40 = vld [vmem:[#allocation2 + $0x5f4] sm:$0xf0]  ;;  %v3124_v15 = vld [vmem:[#allocation2 + $0x588] sm:$0xf] }
  0x7e   :  { %v3173_v49 = vor.u32 %v3727_v40, %v3172_v37  ;;  %v2980_v27 = vld [vmem:[#allocation2 + $0x468] sm:$0xf]  ;;  %v3711_v31 = vld [vmem:[#allocation2 + $0x574] sm:$0xf0] }
  0x7f   :  { %1448 = vmatpush.bf16.msrb.mxu0 %v2485_v46  ;;  %1462 = vmatpush.bf16.msrb.mxu1 %v2613_v47  ;;  %v2662_v46 = vld [vmem:[#allocation2 + $0x1f8] sm:$0xf0]  ;;  %v2805_v47 = vor.u32 %v3635_v33, %v2804_v32  ;;  %v3108_v29 = vld [vmem:[#allocation2 + $0x568] sm:$0xf]  ;;  %v3549_v32 = vld [vmem:[#allocation2 + $0x6c] sm:$0xf]  ;;  %v2981_v37 = vor.u32 %v3679_v28, %v2980_v27 }
  0x80   :  { %1476 = vmatpush.bf16.msrb.mxu2 %v2741_v48  ;;  %v3045_v48 = vor.u32 %v3695_v36, %v3044_v34  ;;  %v2665_v54 = vor.u32 %v3597_v45, %v2662_v46  ;;  %v2470_v33 = vld [vmem:[#allocation2 + $0x78] sm:$0xf0]  ;;  %v3581_v34 = vld [vmem:[#allocation2 + $0x16c] sm:$0xf]  ;;  %v2964_v41 = vld [vmem:[#allocation2 + $0x448] sm:$0xf] }
  0x81   :  { %1490 = vmatpush.bf16.msrb.mxu3 %v2869_v52  ;;  %v3691_v52 = vld [vmem:[#allocation2 + $0x4d4] sm:$0xf0]  ;;  %v2598_v36 = vld [vmem:[#allocation2 + $0x178] sm:$0xf0]  ;;  %v2473_v40 = vor.u32 %v3549_v32, %v2470_v33  ;;  %v3545_v46 = vld [vmem:[#allocation2 + $0x4c] sm:$0xf] }
  0x82   :  { %v3675_v42 = vld [vmem:[#allocation2 + $0x454] sm:$0xf0]  ;;  %v2948_v53 = vld [vmem:[#allocation2 + $0x428] sm:$0xf]  ;;  %v2902_v33 = vld [vmem:[#allocation2 + $0x3d8] sm:$0xf0] }
  0x83   :  { %1449 = vmatpush.bf16.msrb.mxu0 %v2469_v59  ;;  %1463 = vmatpush.bf16.msrb.mxu1 %v2597_v60  ;;  %v3593_v59 = vld [vmem:[#allocation2 + $0x1cc] sm:$0xf]  ;;  %v2646_v60 = vld [vmem:[#allocation2 + $0x1d8] sm:$0xf0]  ;;  %v3707_v45 = vld [vmem:[#allocation2 + $0x554] sm:$0xf0] }
  0x84   :  { %1477 = vmatpush.bf16.msrb.mxu2 %v2725_v61  ;;  %v3029_v61 = vor.u32 %v3691_v52, %v3028_v51  ;;  %v2649_v3 = vor.u32 %v3593_v59, %v2646_v60  ;;  %v3076_v55 = vld [vmem:[#allocation2 + $0x528] sm:$0xf]  ;;  %v3703_v58 = vld [vmem:[#allocation2 + $0x534] sm:$0xf0]  ;;  %v3541_v59 = vld [vmem:[#allocation2 + $0x2c] sm:$0xf] }
  0x85   :  { %1491 = vmatpush.bf16.msrb.mxu3 %v2853_v1  ;;  %v3687_v1 = vld [vmem:[#allocation2 + $0x4b4] sm:$0xf0]  ;;  %v2438_v60 = vld [vmem:[#allocation2 + $0x38] sm:$0xf0]  ;;  %v3077_v2 = vor.u32 %v3703_v58, %v3076_v55  ;;  %v3060_v4 = vld [vmem:[#allocation2 + $0x508] sm:$0xf] }
  0x86   :  { %v3699_v5 = vld [vmem:[#allocation2 + $0x514] sm:$0xf0]  ;;  %v3617_v55 = vld [vmem:[#allocation2 + $0x28c] sm:$0xf] }
  0x87   :  { %1450 = vmatpush.bf16.msrb.mxu0 %v2453_v8  ;;  %1464 = vmatpush.bf16.msrb.mxu1 %v2581_v9  ;;  %v3589_v8 = vld [vmem:[#allocation2 + $0x1ac] sm:$0xf]  ;;  %v2630_v9 = vld [vmem:[#allocation2 + $0x1b8] sm:$0xf0] }
  0x88   :  { %1478 = vmatpush.bf16.msrb.mxu2 %v2709_v10  ;;  %v3013_v10 = vor.u32 %v3687_v1, %v3012_v0  ;;  %v2633_v16 = vor.u32 %v3589_v8, %v2630_v9  ;;  %v2932_v0 = vld [vmem:[#allocation2 + $0x408] sm:$0xf]  ;;  %v3667_v1 = vld [vmem:[#allocation2 + $0x414] sm:$0xf0]  ;;  %v2422_v9 = vld [vmem:[#allocation2 + $0x18] sm:$0xf0] }
  0x89   :  { %1492 = vmatpush.bf16.msrb.mxu3 %v2837_v14  ;;  %v3683_v14 = vld [vmem:[#allocation2 + $0x494] sm:$0xf0]  ;;  %v3649_v58 = vld [vmem:[#allocation2 + $0x38c] sm:$0xf] }
  0x8a   :  { %v2997_v24 = vor.u32 %v3683_v14, %v2996_v13  ;;  %v2790_v13 = vld [vmem:[#allocation2 + $0x2f8] sm:$0xf0]  ;;  %v3661_v14 = vld [vmem:[#allocation2 + $0x3ec] sm:$0xf] }
  0x8b   :  { %1451 = vmatpush.bf16.msrb.mxu0 %v2437_v20  ;;  %1465 = vmatpush.bf16.msrb.mxu1 %v2565_v25  ;;  %v3585_v20 = vld [vmem:[#allocation2 + $0x18c] sm:$0xf]  ;;  %v3125_v25 = vor.u32 %v3715_v17, %v3124_v15  ;;  %v2933_v15 = vor.u32 %v3667_v1, %v2932_v0 }
  0x8c   :  { %1479 = vmatpush.bf16.msrb.mxu2 %v2693_v26  ;;  %v2489_v26 = vor.u32 %v3553_v18, %v2486_v19  ;;  %v3693_v17 = vld [vmem:[#allocation2 + $0x4ec] sm:$0xf]  ;;  %v3046_v18 = vld [vmem:[#allocation2 + $0x4f8] sm:$0xf0]  ;;  %v3061_v19 = vor.u32 %v3699_v5, %v3060_v4 }
  0x8d   :  { %1493 = vmatpush.bf16.msrb.mxu3 %v2821_v30  ;;  %v2617_v30 = vor.u32 %v3585_v20, %v2614_v21  ;;  %v2425_v20 = vor.u32 %v3537_v7, %v2422_v9  ;;  %v3725_v21 = vld [vmem:[#allocation2 + $0x5ec] sm:$0xf]  ;;  %v3049_v28 = vor.u32 %v3693_v17, %v3046_v18  ;;  %v2854_v7 = vld [vmem:[#allocation2 + $0x378] sm:$0xf0] }
  0x8e   :  { %v3645_v4 = vld [vmem:[#allocation2 + $0x36c] sm:$0xf]  ;;  %v2982_v9 = vld [vmem:[#allocation2 + $0x478] sm:$0xf0] }
  0x8f   :  { %1452 = vmatpush.bf16.msrb.mxu0 %v2421_v38  ;;  %1466 = vmatpush.bf16.msrb.mxu1 %v2549_v43  ;;  %v3109_v38 = vor.u32 %v3711_v31, %v3108_v29  ;;  %v3092_v43 = vld [vmem:[#allocation2 + $0x548] sm:$0xf]  ;;  %v3625_v29 = vld [vmem:[#allocation2 + $0x2cc] sm:$0xf] }
  0x90   :  { %1480 = vmatpush.bf16.msrb.mxu2 %v2677_v44  ;;  %v2601_v44 = vor.u32 %v3581_v34, %v2598_v36  ;;  %v3093_v51 = vor.u32 %v3707_v45, %v3092_v43  ;;  %v3657_v31 = vld [vmem:[#allocation2 + $0x3cc] sm:$0xf]  ;;  %v3030_v36 = vld [vmem:[#allocation2 + $0x4d8] sm:$0xf0] }
  0x91   :  { %1494 = vmatpush.bf16.msrb.mxu3 %v2805_v47  ;;  %v2454_v47 = vld [vmem:[#allocation2 + $0x58] sm:$0xf0]  ;;  %v3689_v34 = vld [vmem:[#allocation2 + $0x4cc] sm:$0xf] }
  0x92   :  { %1453 = vmatmul.bf16.vlgmr.msrb.gmra.mxu0 %v3977_v57  ;;  %1467 = vmatmul.bf16.vlgmr.msrb.gmra.mxu1 %v3986_v6  ;;  %v2457_v52 = vor.u32 %v3545_v46, %v2454_v47  ;;  %v3621_v43 = vld [vmem:[#allocation2 + $0x2ac] sm:$0xf]  ;;  %v2886_v47 = vld [vmem:[#allocation2 + $0x3b8] sm:$0xf0] }
  0x93   :  { %1501 = vmatpush.bf16.msra.mxu0 %v3045_v48  ;;  %1515 = vmatpush.bf16.msra.mxu1 %v3173_v49  ;;  %v3577_v48 = vld [vmem:[#allocation2 + $0x14c] sm:$0xf]  ;;  %v2582_v49 = vld [vmem:[#allocation2 + $0x158] sm:$0xf0] }
  0x94   :  { %1529 = vmatpush.bf16.msra.mxu2 %v2537_v50  ;;  %1495 = vmatmul.bf16.vlgmr.msrb.gmra.mxu3 %v4003_v23  ;;  %v2965_v50 = vor.u32 %v3675_v42, %v2964_v41  ;;  %v2585_v56 = vor.u32 %v3577_v48, %v2582_v49  ;;  %v2905_v41 = vor.u32 %v3657_v31, %v2902_v33  ;;  %v3653_v45 = vld [vmem:[#allocation2 + $0x3ac] sm:$0xf]  ;;  %v3014_v49 = vld [vmem:[#allocation2 + $0x4b8] sm:$0xf0] }
  0x95   :  { %1543 = vmatpush.bf16.msra.mxu3 %v2665_v54  ;;  %1481 = vmatmul.bf16.vlgmr.msrb.gmra.mxu2 %v4001_v22  ;;  %v3671_v54 = vld [vmem:[#allocation2 + $0x434] sm:$0xf0]  ;;  %v3033_v42 = vor.u32 %v3689_v34, %v3030_v36  ;;  %v3685_v48 = vld [vmem:[#allocation2 + $0x4ac] sm:$0xf]  ;;  %v2694_v31 = vld [vmem:[#allocation2 + $0x238] sm:$0xf0] }
  0x96   :  { %v3641_v17 = vld [vmem:[#allocation2 + $0x34c] sm:$0xf]  ;;  %v2822_v34 = vld [vmem:[#allocation2 + $0x338] sm:$0xf0] }
  0x97   :  { %1502 = vmatpush.bf16.msra.mxu0 %v3029_v61  ;;  %1516 = vmatpush.bf16.msra.mxu1 %v3157_v62  ;;  %v3573_v61 = vld [vmem:[#allocation2 + $0x12c] sm:$0xf]  ;;  %v2566_v62 = vld [vmem:[#allocation2 + $0x138] sm:$0xf0] }
  0x98   :  { %1530 = vmatpush.bf16.msra.mxu2 %v2521_v63  ;;  %v2949_v63 = vor.u32 %v3671_v54, %v2948_v53  ;;  %v2569_v8 = vor.u32 %v3573_v61, %v2566_v62  ;;  %v2889_v53 = vor.u32 %v3653_v45, %v2886_v47  ;;  %v3017_v54 = vor.u32 %v3685_v48, %v3014_v49  ;;  %v3681_v61 = vld [vmem:[#allocation2 + $0x48c] sm:$0xf]  ;;  %v2998_v62 = vld [vmem:[#allocation2 + $0x498] sm:$0xf0] }
  0x99   :  { %1544 = vmatpush.bf16.msra.mxu3 %v2649_v3  ;;  %v2441_v3 = vor.u32 %v3541_v59, %v2438_v60  ;;  %v2870_v60 = vld [vmem:[#allocation2 + $0x398] sm:$0xf0]  ;;  %v3669_v36 = vld [vmem:[#allocation2 + $0x42c] sm:$0xf] }
  0x9a   :  { %v2873_v1 = vor.u32 %v3649_v58, %v2870_v60  ;;  %v3633_v47 = vld [vmem:[#allocation2 + $0x30c] sm:$0xf]  ;;  %v2806_v48 = vld [vmem:[#allocation2 + $0x318] sm:$0xf0]  ;;  %v3759_v60 = vld [vmem:[#allocation4 + $0xf4] sm:$0xf0] }
  0x9b   :  { %1503 = vmatpush.bf16.msra.mxu0 %v3013_v10  ;;  %1517 = vmatpush.bf16.msra.mxu1 %v3141_v11  ;;  %v3569_v10 = vld [vmem:[#allocation2 + $0x10c] sm:$0xf]  ;;  %v2550_v11 = vld [vmem:[#allocation2 + $0x118] sm:$0xf0] }
  0x9c   :  { %1531 = vmatpush.bf16.msra.mxu2 %v2505_v12  ;;  %v3629_v12 = vld [vmem:[#allocation2 + $0x2ec] sm:$0xf] }
  0x9d   :  { %1545 = vmatpush.bf16.msra.mxu3 %v2633_v16  ;;  %v2918_v16 = vld [vmem:[#allocation2 + $0x3f8] sm:$0xf0] }
  0x9e   :  { %v2921_v27 = vor.u32 %v3661_v14, %v2918_v16  ;;  %v2710_v16 = vld [vmem:[#allocation2 + $0x258] sm:$0xf0] }
  0x9f   :  { %1504 = vmatpush.bf16.msra.mxu0 %v2997_v24  ;;  %1518 = vmatpush.bf16.msra.mxu1 %v3125_v25  ;;  %v3174_v24 = vld [vmem:[#allocation2 + $0x5f8] sm:$0xf0]  ;;  %v2553_v25 = vor.u32 %v3569_v10, %v2550_v11  ;;  %v3709_v10 = vld [vmem:[#allocation2 + $0x56c] sm:$0xf] }
  0xa0   :  { %1532 = vmatpush.bf16.msra.mxu2 %v2489_v26  ;;  %v2793_v26 = vor.u32 %v3629_v12, %v2790_v13  ;;  %v3177_v32 = vor.u32 %v3725_v21, %v3174_v24  ;;  %v3110_v11 = vld [vmem:[#allocation2 + $0x578] sm:$0xf0]  ;;  %v2857_v13 = vor.u32 %v3645_v4, %v2854_v7  ;;  %v3705_v24 = vld [vmem:[#allocation2 + $0x54c] sm:$0xf]  ;;  %v3292_v7 = vld [vmem:[#allocation4 + $0xe0] sm:$0xf] }
  0xa1   :  { %1546 = vmatpush.bf16.msra.mxu3 %v2617_v30  ;;  %v2774_v30 = vld [vmem:[#allocation2 + $0x2d8] sm:$0xf0]  ;;  %v3113_v18 = vor.u32 %v3709_v10, %v3110_v11 }
  0xa2   :  { %v2966_v21 = vld [vmem:[#allocation2 + $0x458] sm:$0xf0] }
  0xa3   :  { %1505 = vmatpush.bf16.msra.mxu0 %v2981_v37  ;;  %1519 = vmatpush.bf16.msra.mxu1 %v3109_v38  ;;  %v3721_v37 = vld [vmem:[#allocation2 + $0x5cc] sm:$0xf]  ;;  %v3158_v38 = vld [vmem:[#allocation2 + $0x5d8] sm:$0xf0] }
  0xa4   :  { %1533 = vmatpush.bf16.msra.mxu2 %v2473_v40  ;;  %v2777_v40 = vor.u32 %v3625_v29, %v2774_v30  ;;  %v3161_v46 = vor.u32 %v3721_v37, %v3158_v38  ;;  %v3605_v30 = vld [vmem:[#allocation2 + $0x22c] sm:$0xf]  ;;  %v2950_v37 = vld [vmem:[#allocation2 + $0x438] sm:$0xf0] }
  0xa5   :  { %1547 = vmatpush.bf16.msra.mxu3 %v2601_v44  ;;  %v2758_v44 = vld [vmem:[#allocation2 + $0x2b8] sm:$0xf0]  ;;  %v2953_v45 = vor.u32 %v3669_v36, %v2950_v37  ;;  %v3751_v36 = vld [vmem:[#allocation4 + $0xb4] sm:$0xf0] }
  0xa7   :  { %1506 = vmatpush.bf16.msra.mxu0 %v2965_v50  ;;  %1520 = vmatpush.bf16.msra.mxu1 %v3093_v51  ;;  %v3717_v50 = vld [vmem:[#allocation2 + $0x5ac] sm:$0xf]  ;;  %v3142_v51 = vld [vmem:[#allocation2 + $0x5b8] sm:$0xf0] }
  0xa8   :  { %1534 = vmatpush.bf16.msra.mxu2 %v2457_v52  ;;  %v2761_v52 = vor.u32 %v3621_v43, %v2758_v44  ;;  %v3145_v59 = vor.u32 %v3717_v50, %v3142_v51  ;;  %v3601_v43 = vld [vmem:[#allocation2 + $0x20c] sm:$0xf]  ;;  %v2934_v51 = vld [vmem:[#allocation2 + $0x418] sm:$0xf0] }
  0xa9   :  { %1548 = vmatpush.bf16.msra.mxu3 %v2585_v56  ;;  %v2742_v56 = vld [vmem:[#allocation2 + $0x298] sm:$0xf0]  ;;  %v3665_v50 = vld [vmem:[#allocation2 + $0x40c] sm:$0xf] }
  0xaa   :  { %v2745_v0 = vor.u32 %v3617_v55, %v2742_v56  ;;  %v3743_v55 = vld [vmem:[#allocation4 + $0x74] sm:$0xf0]  ;;  %v4044_v56 = vld [vmem:[%s4100_s2] sm:$0xf] }
  0xab   :  { %1507 = vmatpush.bf16.msra.mxu0 %v2949_v63  ;;  %1521 = vmatpush.bf16.msra.mxu1 %v3077_v2  ;;  %v3713_v63 = vld [vmem:[#allocation2 + $0x58c] sm:$0xf] }
  0xac   :  { %1535 = vmatpush.bf16.msra.mxu2 %v2441_v3  ;;  %v3613_v2 = vld [vmem:[#allocation2 + $0x26c] sm:$0xf]  ;;  %v2726_v3 = vld [vmem:[#allocation2 + $0x278] sm:$0xf0] }
  0xad   :  { %1549 = vmatpush.bf16.msra.mxu3 %v2569_v8  ;;  %v3677_v8 = vld [vmem:[#allocation2 + $0x46c] sm:$0xf]  ;;  %v2729_v12 = vor.u32 %v3613_v2, %v2726_v3  ;;  %v3228_v2 = vld [vmem:[#allocation4 + $0x60] sm:$0xf]  ;;  %v3741_v3 = vld [vmem:[#allocation4 + $0x64] sm:$0xf0] }
  0xae   :  { %v2985_v14 = vor.u32 %v3677_v8, %v2982_v9  ;;  %v3757_v8 = vld [vmem:[#allocation4 + $0xe4] sm:$0xf0]  ;;  %v3229_v9 = vor.u32 %v3741_v3, %v3228_v2  ;;  %v3758_v2 = vld [vmem:[#allocation4 + $0xf4] sm:$0xf]  ;;  %v3302_v3 = vld [vmem:[#allocation4 + $0xf8] sm:$0xf0] }
  0xaf   :  { %1508 = vmatpush.bf16.msra.mxu0 %v2933_v15  ;;  %1522 = vmatpush.bf16.msra.mxu1 %v3061_v19  ;;  %v3609_v15 = vld [vmem:[#allocation2 + $0x24c] sm:$0xf]  ;;  %v2838_v19 = vld [vmem:[#allocation2 + $0x358] sm:$0xf0]  ;;  %v4039_v38 = vpop.f32.mrf.mxu1 }
  0xb0   :  { %1536 = vmatpush.bf16.msra.mxu2 %v2425_v20  ;;  %v3673_v20 = vld [vmem:[#allocation2 + $0x44c] sm:$0xf] }
  0xb1   :  { %1550 = vmatpush.bf16.msra.mxu3 %v2553_v25  ;;  %v3094_v25 = vld [vmem:[#allocation2 + $0x558] sm:$0xf0] }
  0xb2   :  { %1509 = vmatmul.bf16.vlgmr.msra.gmra.mxu0 %v4019_v35  ;;  %1523 = vmatmul.bf16.vlgmr.msra.gmra.mxu1 %v4021_v39  ;;  %v3097_v33 = vor.u32 %v3705_v24, %v3094_v25 }
  0xb3   :  { %1557 = vmatpush.bf16.msrb.mxu0 %v2793_v26  ;;  %1571 = vmatpush.bf16.msrb.mxu1 %v2921_v27  ;;  %v2713_v26 = vor.u32 %v3609_v15, %v2710_v16  ;;  %v2841_v27 = vor.u32 %v3641_v17, %v2838_v19  ;;  %v1286_v29 = vpop.f32.mrf.mxu0  ;;  %v3293_v15 = vor.u32 %v3757_v8, %v3292_v7  ;;  %v3284_v16 = vld [vmem:[#allocation4 + $0xd0] sm:$0xf]  ;;  %v3755_v17 = vld [vmem:[#allocation4 + $0xd4] sm:$0xf0] }
  0xb4   :  { %1585 = vmatpush.bf16.msrb.mxu2 %v3049_v28  ;;  %1551 = vmatmul.bf16.vlgmr.msra.gmra.mxu3 %v3986_v6  ;;  %v3001_v6 = vor.u32 %v3681_v61, %v2998_v62  ;;  %v2969_v28 = vor.u32 %v3673_v20, %v2966_v21  ;;  %v2809_v61 = vor.u32 %v3633_v47, %v2806_v48  ;;  %v3212_v21 = vld [vmem:[#allocation4 + $0x40] sm:$0xf] }
  0xb5   :  { %1599 = vmatpush.bf16.msrb.mxu3 %v3177_v32  ;;  %1537 = vmatmul.bf16.vlgmr.msra.gmra.mxu2 %v3977_v57  ;;  %v3126_v57 = vld [vmem:[#allocation2 + $0x598] sm:$0xf0]  ;;  %v3637_v32 = vld [vmem:[#allocation2 + $0x32c] sm:$0xf]  ;;  %v2937_v62 = vor.u32 %v3665_v50, %v2934_v51  ;;  %v3285_v24 = vor.u32 %v3755_v17, %v3284_v16  ;;  %v3188_v50 = vld [vmem:[#allocation4 + $0x10] sm:$0xf] }
  0xb6   :  { %v3129_v5 = vor.u32 %v3713_v63, %v3126_v57  ;;  %v2825_v44 = vor.u32 %v3637_v32, %v2822_v34  ;;  %v3268_v34 = vld [vmem:[#allocation4 + $0xb0] sm:$0xf]  ;;  %v3731_v51 = vld [vmem:[#allocation4 + $0x14] sm:$0xf0]  ;;  %v3294_v16 = vld [vmem:[#allocation4 + $0xe8] sm:$0xf0] }
  0xb7   :  { %1558 = vmatpush.bf16.msrb.mxu0 %v2777_v40  ;;  %1572 = vmatpush.bf16.msrb.mxu1 %v2905_v41  ;;  %v3701_v40 = vld [vmem:[#allocation2 + $0x52c] sm:$0xf]  ;;  %v3078_v41 = vld [vmem:[#allocation2 + $0x538] sm:$0xf0]  ;;  %v1328_v10 = vpop.f32.mrf.mxu3 }
  0xb8   :  { %1586 = vmatpush.bf16.msrb.mxu2 %v3033_v42  ;;  %v2697_v42 = vor.u32 %v3605_v30, %v2694_v31  ;;  %v3081_v49 = vor.u32 %v3701_v40, %v3078_v41  ;;  %v3204_v31 = vld [vmem:[#allocation4 + $0x30] sm:$0xf]  ;;  %v3196_v41 = vld [vmem:[#allocation4 + $0x20] sm:$0xf] }
  0xb9   :  { %1600 = vmatpush.bf16.msrb.mxu3 %v3161_v46  ;;  %v2678_v46 = vld [vmem:[#allocation2 + $0x218] sm:$0xf0] }
  0xba   :  { %v2681_v58 = vor.u32 %v3601_v43, %v2678_v46  ;;  %v3269_v43 = vor.u32 %v3751_v36, %v3268_v34  ;;  %v3348_v36 = vld [vmem:[#allocation4 + $0x150] sm:$0xf] }
  0xbb   :  { %1559 = vmatpush.bf16.msrb.mxu0 %v2761_v52  ;;  %1573 = vmatpush.bf16.msrb.mxu1 %v2889_v53  ;;  %v3697_v52 = vld [vmem:[#allocation2 + $0x50c] sm:$0xf]  ;;  %v3062_v53 = vld [vmem:[#allocation2 + $0x518] sm:$0xf0] }
  0xbc   :  { %1587 = vmatpush.bf16.msrb.mxu2 %v3017_v54  ;;  %v3236_v54 = vld [vmem:[#allocation4 + $0x70] sm:$0xf]  ;;  %v3065_v63 = vor.u32 %v3697_v52, %v3062_v53 }
  0xbd   :  { %1601 = vmatpush.bf16.msrb.mxu3 %v3145_v59  ;;  %v3300_v59 = vld [vmem:[#allocation4 + $0xf0] sm:$0xf]  ;;  %v3237_v57 = vor.u32 %v3743_v55, %v3236_v54  ;;  %v3747_v55 = vld [vmem:[#allocation4 + $0x94] sm:$0xf0] }
  0xbe   :  { %v3301_v4 = vor.u32 %v3759_v60, %v3300_v59  ;;  %v3252_v54 = vld [vmem:[#allocation4 + $0x90] sm:$0xf] }
  0xbf   :  { %1560 = vmatpush.bf16.msrb.mxu0 %v2745_v0  ;;  %1574 = vmatpush.bf16.msrb.mxu1 %v2873_v1  ;;  %v279_v1 = vperm.slane %v4044_v56, 0 }
  0xc0   :  { %1588 = vmatpush.bf16.msrb.mxu2 %v3001_v6  ;;  %v1314_v0 = vpop.f32.mrf.mxu2  ;;  %v1288_v6 = vpop.f32.mrf.mxu0 }
  0xc1   :  { %1602 = vmatpush.bf16.msrb.mxu3 %v3129_v5  ;;  %v1302_v5 = vpop.f32.mrf.mxu1  ;;  %v1287_v11 = vadd.f32 %v1286_v29, %v279_v1 }
  0xc3   :  { %1561 = vmatpush.bf16.msrb.mxu0 %v2729_v12  ;;  %1575 = vmatpush.bf16.msrb.mxu1 %v2857_v13  ;;  %v1289_v12 = vadd.f32 %v1288_v6, %v279_v1  ;;  %v3220_v13 = vld [vmem:[#allocation4 + $0x50] sm:$0xf]  ;;  %v1301_v19 = vadd.f32 %v4039_v38, %v1287_v11  ;;  %v3244_v1 = vld [vmem:[#allocation4 + $0x80] sm:$0xf]  ;;  %v3745_v6 = vld [vmem:[#allocation4 + $0x84] sm:$0xf0] }
  0xc4   :  { %1589 = vmatpush.bf16.msrb.mxu2 %v2985_v14  ;;  %v3739_v14 = vld [vmem:[#allocation4 + $0x54] sm:$0xf0]  ;;  %v3245_v11 = vor.u32 %v3745_v6, %v3244_v1 }
  0xc5   :  { %1603 = vmatpush.bf16.msrb.mxu3 %v3113_v18  ;;  %v3221_v18 = vor.u32 %v3739_v14, %v3220_v13  ;;  %v1303_v20 = vadd.f32 %v1302_v5, %v1289_v12  ;;  %v1315_v29 = vadd.f32 %v1314_v0, %v1301_v19  ;;  %v3238_v0 = vld [vmem:[#allocation4 + $0x78] sm:$0xf0]  ;;  %v3740_v12 = vld [vmem:[#allocation4 + $0x64] sm:$0xf]  ;;  %v3230_v13 = vld [vmem:[#allocation4 + $0x68] sm:$0xf0]  ;;  %v3305_v14 = vor.u32 %v3758_v2, %v3302_v3 }
  0xc6   :  { %v3233_v19 = vor.u32 %v3740_v12, %v3230_v13  ;;  %v3730_v2 = vld [vmem:[#allocation4 + $0x14] sm:$0xf]  ;;  %v3340_v3 = vld [vmem:[#allocation4 + $0x140] sm:$0xf]  ;;  %v3254_v13 = vld [vmem:[#allocation4 + $0x98] sm:$0xf0] }
  0xc7   :  { %1562 = vmatpush.bf16.msrb.mxu0 %v2713_v26  ;;  %1576 = vmatpush.bf16.msrb.mxu1 %v2841_v27  ;;  %v3276_v26 = vld [vmem:[#allocation4 + $0xc0] sm:$0xf]  ;;  %v3753_v27 = vld [vmem:[#allocation4 + $0xc4] sm:$0xf0]  ;;  %v1329_v38 = vadd.f32 %v1328_v10, %v1315_v29  ;;  %v3746_v12 = vld [vmem:[#allocation4 + $0x94] sm:$0xf] }
  0xc8   :  { %1590 = vmatpush.bf16.msrb.mxu2 %v2969_v28  ;;  %v1316_v25 = vpop.f32.mrf.mxu2  ;;  %v3277_v32 = vor.u32 %v3753_v27, %v3276_v26  ;;  %v3754_v26 = vld [vmem:[#allocation4 + $0xd4] sm:$0xf]  ;;  %v3286_v27 = vld [vmem:[#allocation4 + $0xd8] sm:$0xf0] }
  0xc9   :  { %1604 = vmatpush.bf16.msrb.mxu3 %v3097_v33  ;;  %v1317_v30 = vadd.f32 %v1316_v25, %v1303_v20  ;;  %v1330_v33 = vpop.f32.mrf.mxu3  ;;  %v3738_v20 = vld [vmem:[#allocation4 + $0x54] sm:$0xf]  ;;  %v3775_v25 = vld [vmem:[#allocation4 + $0x174] sm:$0xf0]  ;;  %v3289_v34 = vor.u32 %v3754_v26, %v3286_v27  ;;  %v3744_v26 = vld [vmem:[#allocation4 + $0x84] sm:$0xf] }
  0xca   :  { %v3246_v27 = vld [vmem:[#allocation4 + $0x88] sm:$0xf0] }
  0xcb   :  { %1563 = vmatpush.bf16.msrb.mxu0 %v2697_v42  ;;  %1577 = vmatpush.bf16.msrb.mxu1 %v2825_v44  ;;  %v1331_v40 = vadd.f32 %v1330_v33, %v1317_v30  ;;  %v3733_v42 = vld [vmem:[#allocation4 + $0x24] sm:$0xf0]  ;;  %v3260_v44 = vld [vmem:[#allocation4 + $0xa0] sm:$0xf]  ;;  %v3214_v33 = vld [vmem:[#allocation4 + $0x48] sm:$0xf0] }
  0xcc   :  { %1591 = vmatpush.bf16.msrb.mxu2 %v2953_v45  ;;  %v3749_v45 = vld [vmem:[#allocation4 + $0xa4] sm:$0xf0]  ;;  %v3197_v47 = vor.u32 %v3733_v42, %v3196_v41  ;;  %v3278_v41 = vld [vmem:[#allocation4 + $0xc8] sm:$0xf0] }
  0xcd   :  { %1605 = vmatpush.bf16.msrb.mxu3 %v3081_v49  ;;  %v3261_v52 = vor.u32 %v3749_v45, %v3260_v44 }
  0xcf   :  { %1564 = vmatpush.bf16.msrb.mxu0 %v2681_v58  ;;  %1578 = vmatpush.bf16.msrb.mxu1 %v2809_v61  ;;  %v1342_v28 = vpop.f32.mrf.mxu0  ;;  %v3189_v58 = vor.u32 %v3731_v51, %v3188_v50  ;;  %v3180_v61 = vld [vmem:[#allocation4] sm:$0xf]  ;;  %v3750_v51 = vld [vmem:[#allocation4 + $0xb4] sm:$0xf] }
  0xd0   :  { %1592 = vmatpush.bf16.msrb.mxu2 %v2937_v62  ;;  %v1343_v48 = vadd.f32 %v1342_v28, %v1329_v38  ;;  %v3729_v62 = vld [vmem:[#allocation4 + $0x4] sm:$0xf0] }
  0xd1   :  { %1606 = vmatpush.bf16.msrb.mxu3 %v3065_v63  ;;  %v3742_v63 = vld [vmem:[#allocation4 + $0x74] sm:$0xf] }
  0xd2   :  { %1565 = vmatmul.bf16.vlgmr.msrb.gmra.mxu0 %v4001_v22  ;;  %1579 = vmatmul.bf16.vlgmr.msrb.gmra.mxu1 %v4003_v23  ;;  %v3737_v22 = vld [vmem:[#allocation4 + $0x44] sm:$0xf0] }
  0xd3   :  { %2015 = vmatpush.bf16.msra.mxu0 %v3237_v57  ;;  %2029 = vmatpush.bf16.msra.mxu1 %v3301_v4  ;;  %v3213_v23 = vor.u32 %v3737_v22, %v3212_v21  ;;  %v3253_v57 = vor.u32 %v3747_v55, %v3252_v54  ;;  %v3181_v4 = vor.u32 %v3729_v62, %v3180_v61  ;;  %v3222_v21 = vld [vmem:[#allocation4 + $0x58] sm:$0xf0]  ;;  %v3732_v55 = vld [vmem:[#allocation4 + $0x24] sm:$0xf]  ;;  %v3262_v62 = vld [vmem:[#allocation4 + $0xa8] sm:$0xf0] }
  0xd4   :  { %1593 = vmatmul.bf16.vlgmr.msrb.gmra.mxu2 %v4019_v35  ;;  %1607 = vmatmul.bf16.vlgmr.msrb.gmra.mxu3 %v4021_v39  ;;  %v1356_v35 = vpop.f32.mrf.mxu1  ;;  %v3735_v39 = vld [vmem:[#allocation4 + $0x34] sm:$0xf0]  ;;  %v3225_v30 = vor.u32 %v3738_v20, %v3222_v21  ;;  %v3748_v61 = vld [vmem:[#allocation4 + $0xa4] sm:$0xf]  ;;  %v3765_v20 = vld [vmem:[#allocation4 + $0x124] sm:$0xf0] }
  0xd5   :  { %v3205_v37 = vor.u32 %v3735_v39, %v3204_v31  ;;  %v1357_v59 = vadd.f32 %v1356_v35, %v1343_v48  ;;  %v3773_v35 = vld [vmem:[#allocation4 + $0x164] sm:$0xf0]  ;;  %v3736_v31 = vld [vmem:[#allocation4 + $0x44] sm:$0xf]  ;;  %v3206_v48 = vld [vmem:[#allocation4 + $0x38] sm:$0xf0] }
  0xd6   :  { %v3217_v44 = vor.u32 %v3736_v31, %v3214_v33  ;;  %v3728_v21 = vld [vmem:[#allocation4 + $0x4] sm:$0xf]  ;;  %v3249_v33 = vor.u32 %v3744_v26, %v3246_v27  ;;  %v3781_v26 = vld [vmem:[#allocation4 + $0x1a4] sm:$0xf0] }
  0xd7   :  { %2016 = vmatpush.bf16.msra.mxu0 %v3229_v9  ;;  %2030 = vmatpush.bf16.msra.mxu1 %v3293_v15  ;;  %v1344_v46 = vpop.f32.mrf.mxu0  ;;  %v1613_v7 = vmax.f32 %v1357_v59, 0.0  ;;  %v3241_v9 = vor.u32 %v3742_v63, %v3238_v0  ;;  %v1384_v10 = vpop.f32.mrf.mxu3  ;;  %v3756_v15 = vld [vmem:[#allocation4 + $0xe4] sm:$0xf] }
  0xd8   :  { %v1345_v49 = vadd.f32 %v1344_v46, %v1331_v40  ;;  %v1370_v5 = vpop.f32.mrf.mxu2  ;;  %v3297_v22 = vor.u32 %v3756_v15, %v3294_v16  ;;  %v3752_v40 = vld [vmem:[#allocation4 + $0xc4] sm:$0xf] }
  0xdb   :  { %2017 = vmatpush.bf16.msra.mxu0 %v3221_v18  ;;  %2031 = vmatpush.bf16.msra.mxu1 %v3285_v24  ;;  %v280_v18 = vperm.slane %v4044_v56, 1  ;;  %v3364_v24 = vld [vmem:[#allocation4 + $0x170] sm:$0xf] }
  0xdc   :  { %v1358_v53 = vpop.f32.mrf.mxu1  ;;  %v3365_v28 = vor.u32 %v3775_v25, %v3364_v24  ;;  %v3257_v24 = vor.u32 %v3746_v12, %v3254_v13  ;;  %v3396_v13 = vld [vmem:[#allocation4 + $0x1b0] sm:$0xf] }
  0xdd   :  { %v1359_v60 = vadd.f32 %v1358_v53, %v1345_v49  ;;  %v1371_v29 = vadd.f32 %v1370_v5, %v280_v18  ;;  %v3281_v49 = vor.u32 %v3752_v40, %v3278_v41  ;;  %v3190_v5 = vld [vmem:[#allocation4 + $0x18] sm:$0xf0]  ;;  %v3308_v41 = vld [vmem:[#allocation4 + $0x100] sm:$0xf] }
  0xde   :  { %2043 = vmatpush.bf16.msra.mxu2 %v3365_v28 }
  0xdf   :  { %2018 = vmatpush.bf16.msra.mxu0 %v3213_v23  ;;  %2032 = vmatpush.bf16.msra.mxu1 %v3277_v32  ;;  %v1617_v8 = vmax.f32 %v1359_v60, 0.0  ;;  %v3356_v23 = vld [vmem:[#allocation4 + $0x160] sm:$0xf]  ;;  %v1386_v38 = vpop.f32.mrf.mxu3  ;;  %v1385_v42 = vadd.f32 %v1384_v10, %v1371_v29  ;;  %v3767_v10 = vld [vmem:[#allocation4 + $0x134] sm:$0xf0] }
  0xe0   :  { %v3357_v39 = vor.u32 %v3773_v35, %v3356_v23  ;;  %v1372_v32 = vpop.f32.mrf.mxu2 }
  0xe1   :  { %v4052_v17 = vpack.c.bf16 %v1617_v8, %v1613_v7  ;;  %v1373_v50 = vadd.f32 %v1372_v32, %v280_v18  ;;  %v3265_v7 = vor.u32 %v3748_v61, %v3262_v62  ;;  %v3193_v18 = vor.u32 %v3730_v2, %v3190_v5  ;;  %v3763_v32 = vld [vmem:[#allocation4 + $0x114] sm:$0xf0]  ;;  %v3768_v62 = vld [vmem:[#allocation4 + $0x144] sm:$0xf]  ;;  %v3404_v5 = vld [vmem:[#allocation4 + $0x1c0] sm:$0xf] }
  0xe2   :  { %2044 = vmatpush.bf16.msra.mxu2 %v3357_v39  ;;  %v3316_v39 = vld [vmem:[#allocation4 + $0x110] sm:$0xf] }
  0xe3   :  { %2019 = vmatpush.bf16.msra.mxu0 %v3205_v37  ;;  %2033 = vmatpush.bf16.msra.mxu1 %v3269_v43  ;;  %v3771_v37 = vld [vmem:[#allocation4 + $0x154] sm:$0xf0]  ;;  %v1387_v60 = vadd.f32 %v1386_v38, %v1373_v50  ;;  %v3428_v50 = vld [vmem:[#allocation4 + $0x1f0] sm:$0xf] }
  0xe4   :  { %v3349_v45 = vor.u32 %v3771_v37, %v3348_v36  ;;  %v3317_v36 = vor.u32 %v3763_v32, %v3316_v39  ;;  %v3310_v39 = vld [vmem:[#allocation4 + $0x108] sm:$0xf0] }
  0xe6   :  { %2045 = vmatpush.bf16.msra.mxu2 %v3349_v45  ;;  %v3366_v45 = vld [vmem:[#allocation4 + $0x178] sm:$0xf0] }
  0xe7   :  { %2020 = vmatpush.bf16.msra.mxu0 %v3197_v47  ;;  %2034 = vmatpush.bf16.msra.mxu1 %v3261_v52  ;;  %v3734_v47 = vld [vmem:[#allocation4 + $0x34] sm:$0xf]  ;;  %v3270_v52 = vld [vmem:[#allocation4 + $0xb8] sm:$0xf0] }
  0xe8   :  { %v3209_v54 = vor.u32 %v3734_v47, %v3206_v48  ;;  %v3273_v59 = vor.u32 %v3750_v51, %v3270_v52  ;;  %v3772_v47 = vld [vmem:[#allocation4 + $0x164] sm:$0xf]  ;;  %v3358_v48 = vld [vmem:[#allocation4 + $0x168] sm:$0xf0]  ;;  %v3791_v51 = vld [vmem:[#allocation4 + $0x1f4] sm:$0xf0] }
  0xe9   :  { %v3429_v52 = vor.u32 %v3791_v51, %v3428_v50 }
  0xeb   :  { %2021 = vmatpush.bf16.msra.mxu0 %v3189_v58  ;;  %2035 = vmatpush.bf16.msra.mxu1 %v3253_v57  ;;  %v3198_v58 = vld [vmem:[#allocation4 + $0x28] sm:$0xf0] }
  0xec   :  { %v3201_v6 = vor.u32 %v3732_v55, %v3198_v58  ;;  %2057 = vmatpush.bf16.msra.mxu3 %v3429_v52  ;;  %v3420_v55 = vld [vmem:[#allocation4 + $0x1e0] sm:$0xf]  ;;  %v3789_v58 = vld [vmem:[#allocation4 + $0x1e4] sm:$0xf0] }
  0xef   :  { %2022 = vmatpush.bf16.msra.mxu0 %v3181_v4  ;;  %2036 = vmatpush.bf16.msra.mxu1 %v3245_v11  ;;  %v1398_v43 = vpop.f32.mrf.mxu0  ;;  %v1412_v46 = vpop.f32.mrf.mxu1  ;;  %v3769_v4 = vld [vmem:[#allocation4 + $0x144] sm:$0xf0] }
  0xf0   :  { %v1399_v53 = vadd.f32 %v1398_v43, %v1385_v42  ;;  %v3341_v8 = vor.u32 %v3769_v4, %v3340_v3  ;;  %v3761_v42 = vld [vmem:[#allocation4 + $0x104] sm:$0xf0]  ;;  %v3766_v3 = vld [vmem:[#allocation4 + $0x134] sm:$0xf]  ;;  %v3334_v4 = vld [vmem:[#allocation4 + $0x138] sm:$0xf0] }
  0xf1   :  { %v3309_v43 = vor.u32 %v3761_v42, %v3308_v41 }
  0xf2   :  { %2023 = vmatmul.bf16.vlgmr.msra.gmra.mxu0 %v4052_v17  ;;  %v1413_v57 = vadd.f32 %v1412_v46, %v1399_v53  ;;  %2046 = vmatpush.bf16.msra.mxu2 %v3341_v8  ;;  %v3770_v53 = vld [vmem:[#allocation4 + $0x154] sm:$0xf]  ;;  %v3785_v8 = vld [vmem:[#allocation4 + $0x1c4] sm:$0xf0] }
  0xf3   :  { %2071 = vmatpush.bf16.msrb.mxu0 %v3241_v9  ;;  %2085 = vmatpush.bf16.msrb.mxu1 %v3305_v14  ;;  %v3332_v9 = vld [vmem:[#allocation4 + $0x130] sm:$0xf]  ;;  %v3405_v12 = vor.u32 %v3785_v8, %v3404_v5  ;;  %v3398_v8 = vld [vmem:[#allocation4 + $0x1b8] sm:$0xf0] }
  0xf4   :  { %v3333_v15 = vor.u32 %v3767_v10, %v3332_v9  ;;  %v3764_v9 = vld [vmem:[#allocation4 + $0x124] sm:$0xf]  ;;  %v3326_v10 = vld [vmem:[#allocation4 + $0x128] sm:$0xf0] }
  0xf6   :  { %2047 = vmatpush.bf16.msra.mxu2 %v3333_v15 }
  0xf7   :  { %2072 = vmatpush.bf16.msrb.mxu0 %v3233_v19  ;;  %2086 = vmatpush.bf16.msrb.mxu1 %v3297_v22  ;;  %v1400_v0 = vpop.f32.mrf.mxu0  ;;  %v1440_v1 = vpop.f32.mrf.mxu3  ;;  %v3324_v19 = vld [vmem:[#allocation4 + $0x120] sm:$0xf]  ;;  %v3182_v22 = vld [vmem:[#allocation4 + $0x8] sm:$0xf0] }
  0xf8   :  { %v1426_v63 = vpop.f32.mrf.mxu2  ;;  %v1401_v11 = vadd.f32 %v1400_v0, %v1387_v60  ;;  %v1414_v14 = vpop.f32.mrf.mxu1  ;;  %v3325_v23 = vor.u32 %v3765_v20, %v3324_v19  ;;  %v3185_v31 = vor.u32 %v3728_v21, %v3182_v22  ;;  %v3421_v60 = vor.u32 %v3789_v58, %v3420_v55  ;;  %v3318_v19 = vld [vmem:[#allocation4 + $0x118] sm:$0xf0] }
  0xf9   :  { %v1427_v16 = vadd.f32 %v1426_v63, %v1413_v57  ;;  %v3342_v63 = vld [vmem:[#allocation4 + $0x148] sm:$0xf0]  ;;  %v281_v0 = vperm.slane %v4044_v56, 2 }
  0xfa   :  { %v1415_v25 = vadd.f32 %v1414_v14, %v1401_v11  ;;  %2048 = vmatpush.bf16.msra.mxu2 %v3325_v23  ;;  %2058 = vmatpush.bf16.msra.mxu3 %v3421_v60  ;;  %v3345_v57 = vor.u32 %v3768_v62, %v3342_v63  ;;  %v3783_v14 = vld [vmem:[#allocation4 + $0x1b4] sm:$0xf0]  ;;  %v3786_v62 = vld [vmem:[#allocation4 + $0x1d4] sm:$0xf]  ;;  %v3414_v63 = vld [vmem:[#allocation4 + $0x1d8] sm:$0xf0] }
  0xfb   :  { %2073 = vmatpush.bf16.msrb.mxu0 %v3225_v30  ;;  %2087 = vmatpush.bf16.msrb.mxu1 %v3289_v34  ;;  %v1441_v35 = vadd.f32 %v1440_v1, %v1427_v16  ;;  %v3412_v1 = vld [vmem:[#allocation4 + $0x1d0] sm:$0xf]  ;;  %v3329_v16 = vor.u32 %v3764_v9, %v3326_v10  ;;  %v3397_v21 = vor.u32 %v3783_v14, %v3396_v13  ;;  %v3780_v10 = vld [vmem:[#allocation4 + $0x1a4] sm:$0xf]  ;;  %v282_v13 = vperm.slane %v4044_v56, 3 }
  0xfd   :  { %v1614_v37 = vmax.f32 %v1441_v35, 0.0 }
  0xfe   :  { %2049 = vmatpush.bf16.msra.mxu2 %v3317_v36  ;;  %v3380_v36 = vld [vmem:[#allocation4 + $0x190] sm:$0xf] }
  0xff   :  { %2074 = vmatpush.bf16.msrb.mxu0 %v3217_v44  ;;  %2088 = vmatpush.bf16.msrb.mxu1 %v3281_v49  ;;  %v1442_v30 = vpop.f32.mrf.mxu3  ;;  %v3774_v44 = vld [vmem:[#allocation4 + $0x174] sm:$0xf]  ;;  %v3361_v49 = vor.u32 %v3772_v47, %v3358_v48 }
 0x100   :  { %v1428_v28 = vpop.f32.mrf.mxu2  ;;  %v3369_v46 = vor.u32 %v3774_v44, %v3366_v45  ;;  %v3372_v45 = vld [vmem:[#allocation4 + $0x180] sm:$0xf]  ;;  %v3790_v48 = vld [vmem:[#allocation4 + $0x1f4] sm:$0xf] }
 0x101   :  { %v1429_v29 = vadd.f32 %v1428_v28, %v1415_v25  ;;  %v3388_v25 = vld [vmem:[#allocation4 + $0x1a0] sm:$0xf] }
 0x102   :  { %2050 = vmatpush.bf16.msra.mxu2 %v3309_v43  ;;  %v3389_v35 = vor.u32 %v3781_v26, %v3388_v25 }
 0x103   :  { %2075 = vmatpush.bf16.msrb.mxu0 %v3209_v54  ;;  %2089 = vmatpush.bf16.msrb.mxu1 %v3273_v59  ;;  %v1443_v34 = vadd.f32 %v1442_v30, %v1429_v29  ;;  %v3350_v54 = vld [vmem:[#allocation4 + $0x158] sm:$0xf0] }
 0x105   :  { %v1618_v38 = vmax.f32 %v1443_v34, 0.0 }
 0x106   :  { %2099 = vmatpush.bf16.msrb.mxu2 %v3369_v46  ;;  %v3777_v46 = vld [vmem:[#allocation4 + $0x184] sm:$0xf0] }
 0x107   :  { %2076 = vmatpush.bf16.msrb.mxu0 %v3201_v6  ;;  %2090 = vmatpush.bf16.msrb.mxu1 %v3265_v7  ;;  %v1622_v40 = vpack.c.bf16 %v1618_v38, %v1614_v37  ;;  %v3787_v6 = vld [vmem:[#allocation4 + $0x1d4] sm:$0xf0]  ;;  %v3337_v7 = vor.u32 %v3766_v3, %v3334_v4  ;;  %v3373_v47 = vor.u32 %v3777_v46, %v3372_v45  ;;  %v3798_v46 = vld [vmem:[#allocation6 + $0x30] sm:$0xff] }
 0x108   :  { %v3413_v2 = vor.u32 %v3787_v6, %v3412_v1  ;;  %v3779_v37 = vld [vmem:[#allocation4 + $0x194] sm:$0xf0]  ;;  %v3784_v6 = vld [vmem:[#allocation4 + $0x1c4] sm:$0xf] }
 0x109   :  { %2037 = vmatmul.bf16.vlgmr.msra.gmra.mxu1 %v1622_v40  ;;  %v3799_v45 = vld [vmem:[#allocation6 + $0x38] sm:$0xff] }
 0x10a   :  { %2100 = vmatpush.bf16.msrb.mxu2 %v3361_v49  ;;  %2059 = vmatpush.bf16.msra.mxu3 %v3413_v2  ;;  %v3430_v49 = vld [vmem:[#allocation4 + $0x1f8] sm:$0xf0]  ;;  %v3406_v2 = vld [vmem:[#allocation4 + $0x1c8] sm:$0xf0] }
 0x10b   :  { %2077 = vmatpush.bf16.msrb.mxu0 %v3193_v18  ;;  %2091 = vmatpush.bf16.msrb.mxu1 %v3257_v24  ;;  %v3762_v18 = vld [vmem:[#allocation4 + $0x114] sm:$0xf]  ;;  %v3433_v51 = vor.u32 %v3790_v48, %v3430_v49  ;;  %v3409_v3 = vor.u32 %v3784_v6, %v3406_v2  ;;  %v3796_v48 = vld [vmem:[#allocation6 + $0x20] sm:$0xff]  ;;  %v3795_v49 = vld [vmem:[#allocation6 + $0x18] sm:$0xff] }
 0x10c   :  { %v3321_v28 = vor.u32 %v3762_v18, %v3318_v19  ;;  %v3776_v18 = vld [vmem:[#allocation4 + $0x184] sm:$0xf] }
 0x10e   :  { %2060 = vmatpush.bf16.msra.mxu3 %v3405_v12 }
 0x10f   :  { %2078 = vmatpush.bf16.msrb.mxu0 %v3185_v31  ;;  %2092 = vmatpush.bf16.msrb.mxu1 %v3249_v33  ;;  %v1454_v59 = vpop.f32.mrf.mxu0  ;;  %v1468_v61 = vpop.f32.mrf.mxu1  ;;  %v3760_v31 = vld [vmem:[#allocation4 + $0x104] sm:$0xf] }
 0x110   :  { %v1455_v11 = vadd.f32 %v1454_v59, %v281_v0  ;;  %v3313_v33 = vor.u32 %v3760_v31, %v3310_v39 }
 0x112   :  { %2079 = vmatmul.bf16.vlgmr.msrb.gmra.mxu0 %v4052_v17  ;;  %v3353_v17 = vor.u32 %v3770_v53, %v3350_v54  ;;  %v1469_v22 = vadd.f32 %v1468_v61, %v1455_v11  ;;  %2061 = vmatpush.bf16.msra.mxu3 %v3397_v21  ;;  %v3788_v54 = vld [vmem:[#allocation4 + $0x1e4] sm:$0xf]  ;;  %v3390_v11 = vld [vmem:[#allocation4 + $0x1a8] sm:$0xf0] }
 0x113   :  { %v3393_v12 = vor.u32 %v3780_v10, %v3390_v11  ;;  %2265 = vmatpush.bf16.msra.mxu0 %v3799_v45  ;;  %v3808_v45 = vld [vmem:[%s4105_s7] sm:$0xff] }
 0x114   :  { %2101 = vmatpush.bf16.msrb.mxu2 %v3353_v17  ;;  %v3422_v17 = vld [vmem:[#allocation4 + $0x1e8] sm:$0xf0] }
 0x115   :  { %v3425_v59 = vor.u32 %v3788_v54, %v3422_v17  ;;  %v3805_v54 = vld [vmem:[#allocation6 + $0x68] sm:$0xff]  ;;  %v3792_v17 = vld [vmem:[#allocation6] sm:$0xff] }
 0x116   :  { %2062 = vmatpush.bf16.msra.mxu3 %v3389_v35 }
 0x117   :  { %v1456_v20 = vpop.f32.mrf.mxu0  ;;  %v1470_v24 = vpop.f32.mrf.mxu1  ;;  %2266 = vmatpush.bf16.msra.mxu0 %v3798_v46 }
 0x118   :  { %2102 = vmatpush.bf16.msrb.mxu2 %v3345_v57  ;;  %v1482_v15 = vpop.f32.mrf.mxu2  ;;  %v1496_v27 = vpop.f32.mrf.mxu3  ;;  %v1457_v23 = vadd.f32 %v1456_v20, %v281_v0  ;;  %v3417_v0 = vor.u32 %v3786_v62, %v3414_v63  ;;  %v3801_v63 = vld [vmem:[#allocation6 + $0x48] sm:$0xff] }
 0x119   :  { %2093 = vmatmul.bf16.vlgmr.msrb.gmra.mxu1 %v1622_v40  ;;  %v1483_v29 = vadd.f32 %v1482_v15, %v1469_v22  ;;  %v3381_v40 = vor.u32 %v3779_v37, %v3380_v36  ;;  %v3778_v15 = vld [vmem:[#allocation4 + $0x194] sm:$0xf] }
 0x11a   :  { %v1471_v30 = vadd.f32 %v1470_v24, %v1457_v23  ;;  %v3374_v24 = vld [vmem:[#allocation4 + $0x188] sm:$0xf0] }
 0x11b   :  { %v1497_v34 = vadd.f32 %v1496_v27, %v1483_v29  ;;  %2063 = vmatpush.bf16.msra.mxu3 %v3381_v40  ;;  %v3377_v25 = vor.u32 %v3776_v18, %v3374_v24 }
 0x11c   :  { %2103 = vmatpush.bf16.msrb.mxu2 %v3337_v7  ;;  %v3782_v7 = vld [vmem:[#allocation4 + $0x1b4] sm:$0xf] }
 0x11d   :  { %v3401_v9 = vor.u32 %v3782_v7, %v3398_v8 }
 0x11f   :  { %2064 = vmatpush.bf16.msra.mxu3 %v3373_v47  ;;  %v3797_v47 = vld [vmem:[#allocation6 + $0x28] sm:$0xff] }
 0x120   :  { %2104 = vmatpush.bf16.msrb.mxu2 %v3329_v16  ;;  %v1484_v32 = vpop.f32.mrf.mxu2  ;;  %v1498_v43 = vpop.f32.mrf.mxu3  ;;  %v3382_v16 = vld [vmem:[#allocation4 + $0x198] sm:$0xf0]  ;;  %2267 = vmatpush.bf16.msra.mxu0 %v3797_v47 }
 0x121   :  { %v1485_v42 = vadd.f32 %v1484_v32, %v1471_v30  ;;  %v3385_v22 = vor.u32 %v3778_v15, %v3382_v16 }
 0x123   :  { %v1499_v50 = vadd.f32 %v1498_v43, %v1485_v42  ;;  %2113 = vmatpush.bf16.msrb.mxu3 %v3433_v51  ;;  %v3794_v51 = vld [vmem:[#allocation6 + $0x10] sm:$0xff] }
 0x124   :  { %2105 = vmatpush.bf16.msrb.mxu2 %v3321_v28  ;;  %2268 = vmatpush.bf16.msra.mxu0 %v3796_v48  ;;  %v3825_v48 = vld [vmem:[%s4104_s6] ss:$0 sm:$0xff] }
 0x127   :  { %2114 = vmatpush.bf16.msrb.mxu3 %v3425_v59  ;;  %v3802_v59 = vld [vmem:[#allocation6 + $0x50] sm:$0xff] }
 0x128   :  { %2106 = vmatpush.bf16.msrb.mxu2 %v3313_v33  ;;  %2269 = vmatpush.bf16.msra.mxu0 %v3795_v49 }
 0x12b   :  { %2115 = vmatpush.bf16.msrb.mxu3 %v3417_v0  ;;  %v3800_v0 = vld [vmem:[#allocation6 + $0x40] sm:$0xff] }
 0x12c   :  { %2270 = vmatpush.bf16.msra.mxu0 %v3794_v51 }
 0x12f   :  { %v1510_v38 = vpop.f32.mrf.mxu0  ;;  %v1524_v41 = vpop.f32.mrf.mxu1  ;;  %2116 = vmatpush.bf16.msrb.mxu3 %v3409_v3 }
 0x130   :  { %v1511_v44 = vadd.f32 %v1510_v38, %v1497_v34 }
 0x132   :  { %v1525_v52 = vadd.f32 %v1524_v41, %v1511_v44 }
 0x133   :  { %2117 = vmatpush.bf16.msrb.mxu3 %v3401_v9 }
 0x134   :  { %v1615_v60 = vmax.f32 %v1525_v52, 0.0  ;;  %v3806_v52 = vld [vmem:[#allocation6 + $0x70] sm:$0xff] }
 0x137   :  { %v1512_v53 = vpop.f32.mrf.mxu0  ;;  %v1526_v58 = vpop.f32.mrf.mxu1  ;;  %2118 = vmatpush.bf16.msrb.mxu3 %v3393_v12 }
 0x138   :  { %v1513_v55 = vadd.f32 %v1512_v53, %v1499_v50  ;;  %v1538_v4 = vpop.f32.mrf.mxu2  ;;  %v1552_v5 = vpop.f32.mrf.mxu3  ;;  %v3807_v50 = vld [vmem:[#allocation6 + $0x78] sm:$0xff]  ;;  %v3793_v53 = vld [vmem:[#allocation6 + $0x8] sm:$0xff] }
 0x139   :  { %v1539_v19 = vadd.f32 %v1538_v4, %v282_v13  ;;  %2279 = vmatpush.bf16.msra.mxu1 %v3807_v50  ;;  %2271 = vmatpush.bf16.msra.mxu0 %v3793_v53 }
 0x13a   :  { %v1527_v61 = vadd.f32 %v1526_v58, %v1513_v55  ;;  %v3804_v55 = vld [vmem:[#allocation6 + $0x60] sm:$0xff]  ;;  %v3803_v58 = vld [vmem:[#allocation6 + $0x58] sm:$0xff] }
 0x13b   :  { %2119 = vmatpush.bf16.msrb.mxu3 %v3385_v22  ;;  %v1553_v27 = vadd.f32 %v1552_v5, %v1539_v19 }
 0x13c   :  { %v1619_v57 = vmax.f32 %v1527_v61, 0.0 }
 0x13d   :  { %2280 = vmatpush.bf16.msra.mxu1 %v3806_v52  ;;  %2272 = vmatpush.bf16.msra.mxu0 %v3792_v17 }
 0x13e   :  { %v1623_v1 = vpack.c.bf16 %v1619_v57, %v1615_v60  ;;  %v1689_v57 = vld [vmem:[%s4102_s4] sm:$0x3] }
 0x13f   :  { %2120 = vmatpush.bf16.msrb.mxu3 %v3377_v25 }
 0x140   :  { %2051 = vmatmul.bf16.vlgmr.msra.gmra.mxu2 %v1623_v1  ;;  %v1540_v14 = vpop.f32.mrf.mxu2  ;;  %v1554_v20 = vpop.f32.mrf.mxu3 }
 0x141   :  { %v1541_v28 = vadd.f32 %v1540_v14, %v282_v13  ;;  %2281 = vmatpush.bf16.msra.mxu1 %v3805_v54 }
 0x143   :  { %v1555_v56 = vadd.f32 %v1554_v20, %v1541_v28 }
 0x145   :  { %2282 = vmatpush.bf16.msra.mxu1 %v3804_v55 }
 0x149   :  { %2283 = vmatpush.bf16.msra.mxu1 %v3803_v58 }
 0x14d   :  { %2284 = vmatpush.bf16.msra.mxu1 %v3802_v59  ;;  %v3826_v59 = vld [vmem:[%s4106_s8] ss:$0 sm:$0xff] }
 0x14f   :  { %v1566_v21 = vpop.f32.mrf.mxu0  ;;  %v1580_v26 = vpop.f32.mrf.mxu1 }
 0x150   :  { %2107 = vmatmul.bf16.vlgmr.msrb.gmra.mxu2 %v1623_v1  ;;  %v1567_v23 = vadd.f32 %v1566_v21, %v1553_v27  ;;  %v1691_v1 = vperm.slane %v1689_v57, 0  ;;  %v1692_v21 = vperm.slane %v1689_v57, 1 }
 0x151   :  { %2285 = vmatpush.bf16.msra.mxu1 %v3801_v63 }
 0x152   :  { %v1581_v31 = vadd.f32 %v1580_v26, %v1567_v23 }
 0x155   :  { %2286 = vmatpush.bf16.msra.mxu1 %v3800_v0 }
 0x157   :  { %v1594_v35 = vpop.f32.mrf.mxu2  ;;  %v1608_v29 = vpop.f32.mrf.mxu3 }
 0x158   :  { %v1568_v30 = vpop.f32.mrf.mxu0  ;;  %v1595_v32 = vadd.f32 %v1594_v35, %v1581_v31  ;;  %v1582_v33 = vpop.f32.mrf.mxu1 }
 0x159   :  { %v1569_v39 = vadd.f32 %v1568_v30, %v1555_v56 }
 0x15a   :  { %v1609_v37 = vadd.f32 %v1608_v29, %v1595_v32 }
 0x15b   :  { %v1583_v34 = vadd.f32 %v1582_v33, %v1569_v39 }
 0x15c   :  { %v1616_v42 = vmax.f32 %v1609_v37, 0.0  ;;  %v3815_v37 = vld [vmem:[%s4105_s7 + $0x38] sm:$0xff] }
 0x15d   :  { %2364 = vmatpush.bf16.msra.mxu2 %v3815_v37 }
 0x15f   :  { %v1596_v36 = vpop.f32.mrf.mxu2  ;;  %v1610_v40 = vpop.f32.mrf.mxu3 }
 0x160   :  { %v1597_v38 = vadd.f32 %v1596_v36, %v1583_v34 }
 0x162   :  { %v1611_v41 = vadd.f32 %v1610_v40, %v1597_v38  ;;  %v3814_v38 = vld [vmem:[%s4105_s7 + $0x30] sm:$0xff]  ;;  %v3813_v40 = vld [vmem:[%s4105_s7 + $0x28] sm:$0xff] }
 0x163   :  { %2365 = vmatpush.bf16.msra.mxu2 %v3814_v38 }
 0x164   :  { %v1620_v43 = vmax.f32 %v1611_v41, 0.0  ;;  %v3812_v41 = vld [vmem:[%s4105_s7 + $0x20] sm:$0xff] }
 0x166   :  { %v1624_v44 = vpack.c.bf16 %v1620_v43, %v1616_v42  ;;  %v3811_v42 = vld [vmem:[%s4105_s7 + $0x18] sm:$0xff]  ;;  %v3810_v43 = vld [vmem:[%s4105_s7 + $0x10] sm:$0xff] }
 0x167   :  { %2366 = vmatpush.bf16.msra.mxu2 %v3813_v40 }
 0x168   :  { %2065 = vmatmul.bf16.vlgmr.msra.gmra.mxu3 %v1624_v44 }
 0x16b   :  { %2367 = vmatpush.bf16.msra.mxu2 %v3812_v41 }
 0x16f   :  { %v2024_v60 = vpop.f32.mrf.mxu0  ;;  %2368 = vmatpush.bf16.msra.mxu2 %v3811_v42 }
 0x170   :  { %v2025_v5 = vadd.f32 %v2024_v60, %v1691_v1 }
 0x173   :  { %2369 = vmatpush.bf16.msra.mxu2 %v3810_v43 }
 0x177   :  { %v2026_v6 = vpop.f32.mrf.mxu0 }
 0x178   :  { %2121 = vmatmul.bf16.vlgmr.msrb.gmra.mxu3 %v1624_v44  ;;  %v2027_v7 = vadd.f32 %v2026_v6, %v1691_v1  ;;  %v3809_v44 = vld [vmem:[%s4105_s7 + $0x8] sm:$0xff] }
 0x179   :  { %2370 = vmatpush.bf16.msra.mxu2 %v3809_v44 }
 0x17d   :  { %2371 = vmatpush.bf16.msra.mxu2 %v3808_v45 }
 0x186   :  { %v2038_v61 = vpop.f32.mrf.mxu1 }
 0x187   :  { %v2039_v8 = vadd.f32 %v2038_v61, %v2025_v5 }
 0x18e   :  { %v2040_v2 = vpop.f32.mrf.mxu1 }
 0x18f   :  { %v2041_v9 = vadd.f32 %v2040_v2, %v2027_v7  ;;  %v2080_v11 = vpop.f32.mrf.mxu0 }
 0x190   :  { %v2081_v26 = vadd.f32 %v2080_v11, %v1692_v21 }
 0x196   :  { %v2094_v14 = vpop.f32.mrf.mxu1 }
 0x197   :  { %v2082_v24 = vpop.f32.mrf.mxu0  ;;  %v2095_v23 = vadd.f32 %v2094_v14, %v2081_v26 }
 0x198   :  { %v2083_v28 = vadd.f32 %v2082_v24, %v1692_v21 }
 0x19e   :  { %v2096_v27 = vpop.f32.mrf.mxu1 }
 0x19f   :  { %v2097_v56 = vadd.f32 %v2096_v27, %v2083_v28 }
 0x1c3   :  { %v2052_v62 = vpop.f32.mrf.mxu2 }
 0x1c4   :  { %v2053_v10 = vadd.f32 %v2052_v62, %v2039_v8 }
 0x1cb   :  { %v2054_v3 = vpop.f32.mrf.mxu2 }
 0x1cc   :  { %v2055_v12 = vadd.f32 %v2054_v3, %v2041_v9 }
 0x1d3   :  { %v2108_v18 = vpop.f32.mrf.mxu2 }
 0x1d4   :  { %v2109_v29 = vadd.f32 %v2108_v18, %v2095_v23 }
 0x1db   :  { %v2110_v35 = vpop.f32.mrf.mxu2 }
 0x1dc   :  { %v2111_v30 = vadd.f32 %v2110_v35, %v2097_v56 }
 0x1eb   :  { %v2066_v4 = vpop.f32.mrf.mxu3 }
 0x1ec   :  { %v2067_v13 = vadd.f32 %v2066_v4, %v2053_v10 }
 0x1ee   :  { %v2127_v19 = vmax.f32 %v2067_v13, 0.0 }
 0x1f3   :  { %v2068_v15 = vpop.f32.mrf.mxu3 }
 0x1f4   :  { %v2069_v16 = vadd.f32 %v2068_v15, %v2055_v12 }
 0x1f6   :  { %v2129_v20 = vmax.f32 %v2069_v16, 0.0 }
 0x1f8   :  { %v2131_v22 = vpack.c.bf16 %v2129_v20, %v2127_v19 }
 0x1fa   :  { %2273 = vmatmul.bf16.vlgmr.msra.gmra.mxu0 %v2131_v22 }
 0x1fb   :  { %v2122_v25 = vpop.f32.mrf.mxu3 }
 0x1fc   :  { %v2123_v31 = vadd.f32 %v2122_v25, %v2109_v29 }
 0x1fe   :  { %v2128_v33 = vmax.f32 %v2123_v31, 0.0 }
 0x203   :  { %v2124_v39 = vpop.f32.mrf.mxu3 }
 0x204   :  { %v2125_v32 = vadd.f32 %v2124_v39, %v2111_v30 }
 0x206   :  { %v2130_v34 = vmax.f32 %v2125_v32, 0.0 }
 0x208   :  { %v2132_v36 = vpack.c.bf16 %v2130_v34, %v2128_v33 }
 0x20a   :  { %2287 = vmatmul.bf16.vlgmr.msra.gmra.mxu1 %v2132_v36 }
 0x277   :  { %v2274_v46 = vpop.f32.mrf.mxu0 }
 0x278   :  { %v2275_v50 = vadd.f32 %v3825_v48, %v2274_v46 }
 0x27f   :  { %v2276_v49 = vpop.f32.mrf.mxu0 }
 0x280   :  { %v2277_v51 = vadd.f32 %v3825_v48, %v2276_v49 }
 0x287   :  { %v2288_v47 = vpop.f32.mrf.mxu1 }
 0x288   :  { %v2289_v52 = vadd.f32 %v2288_v47, %v2275_v50 }
 0x28a   :  { %v2293_v17 = vmax.f32 %v2289_v52, 0.0 }
 0x28f   :  { %v2290_v53 = vpop.f32.mrf.mxu1 }
 0x290   :  { %v2291_v54 = vadd.f32 %v2290_v53, %v2277_v51 }
 0x292   :  { %v2294_v55 = vmax.f32 %v2291_v54, 0.0 }
 0x294   :  { %v2295_v58 = vpack.c.bf16 %v2294_v55, %v2293_v17 }
 0x296   :  { %2372 = vmatmul.bf16.vlgmr.msra.gmra.mxu2 %v2295_v58 }
 0x319   :  { %v2373_v60 = vpop.f32.mrf.mxu2 }
 0x31a   :  { %v2374_v61 = vadd.f32 %v3826_v59, %v2373_v60 }
 0x31c   :  { %2378 = vst [vmem:[%s4107_s9] sm:$0xff] %v2374_v61 }
 0x321   :  { %v2375_v62 = vpop.f32.mrf.mxu2 }
 0x322   :  { %v2376_v63 = vadd.f32 %v3826_v59, %v2375_v62 }
 0x324   :  { %2379 = vst [vmem:[%s4107_s9 + $0x8] sm:$0xff] %v2376_v63 }
 0x325   :  { %2384 = vsyncpa [#allocation3], 1 }
 0x326   :  { %2385 = vsyncpa [#allocation5], 1 }

</bundles_post_ra>
